<compile_context>
chip_gen: v7x
topology: tpu7x:2x2x1
jax: 0.10.0
libtpu: 0.0.40
codegen_flags: <defaults>
</compile_context>

<pallas_src>
import functools

import jax
import jax.numpy as jnp
from jax.experimental import pallas as pl
from jax.experimental.pallas import tpu as pltpu


def _round_up(v, m):
    return ((v + m - 1) // m) * m


@functools.lru_cache(maxsize=None)
def _tpu_vmem_bytes():
    """Physical VMEM per TensorCore (fallback: conservative v7x value)."""
    try:
        info_fn = getattr(pltpu, "get_tpu_info", None)
        if info_fn is not None:
            return int(info_fn().vmem_capacity_bytes)
    except Exception:
        pass
    return 64 << 20


@functools.lru_cache(maxsize=None)
def _num_tensorcores():
    """TensorCores per device (best effort; 1 if unknown)."""
    try:
        dev = jax.devices()[0]
        for attr in ("num_cores", "core_count", "num_cores_on_chip"):
            v = getattr(dev, attr, None)
            if isinstance(v, int) and v > 0:
                return v
    except Exception:
        pass
    return 1


def _pad_gate_cols(w, h, hp):
    """Pad the last (3*H) gate-stacked axis to 3*Hp, zero-padding each gate block."""
    lead = w.shape[:-1]
    w3 = w.reshape(*lead, 3, h)
    pad = [(0, 0)] * (w3.ndim - 1) + [(0, hp - h)]
    return jnp.pad(w3, pad).reshape(*lead, 3 * hp)


def _gru_chunk_kernel(x_ref, w_ih_ref, b_gi_ref, w_hh_ref, b_hn_ref, h0_ref,
                      out_ref, gi_scr, h_scr, *, hidden_pad, chunk, unroll):
    """One grid step = `chunk` recurrent timesteps of one batch block.

    x_ref:    (TS, BB, Dp)       raw inputs (streamed dtype)
    w_ih_ref: (Dp, 3*Hp)         input weights     (grid-invariant)
    b_gi_ref: (1, 3*Hp)  f32     b_ih + [b_hr, b_hz, 0]  (folded bias)
    w_hh_ref: (Hp, 3*Hp)         recurrent weights (grid-invariant)
    b_hn_ref: (1, Hp)    f32     n-gate recurrent bias
    h0_ref:   (1, BB, Hp) f32    initial hidden state for this batch block
    out_ref:  (TS, BB, Hp)       per-timestep hidden outputs
    gi_scr:   (TS, BB, 3*Hp) f32 whole-chunk input projection scratch
    h_scr:    (BB, Hp)   f32     hidden state carried across time grid steps
    """
    t_blk = pl.program_id(1)

    @pl.when(t_blk == 0)
    def _init():
        h_scr[...] = h0_ref[0].astype(jnp.float32)

    hp = hidden_pad
    ts = chunk
    bb = h_scr.shape[0]
    dp = x_ref.shape[-1]

    # ---- whole-chunk input projection: one well-shaped MXU matmul ----------
    w_ih = w_ih_ref[...]
    x2d = x_ref[...].reshape(ts * bb, dp).astype(w_ih.dtype)
    gi = jnp.dot(x2d, w_ih, preferred_element_type=jnp.float32)
    gi = gi + b_gi_ref[...].astype(jnp.float32)          # one broadcast per chunk
    gi_scr[...] = gi.reshape(ts, bb, 3 * hp)

    # ---- serial recurrence ---------------------------------------------------
    w_hh = w_hh_ref[...]
    # Hoist the bias broadcast out of the unrolled inner loop (no CSE in JAX).
    b_hn = jnp.broadcast_to(b_hn_ref[...].astype(jnp.float32), (bb, hp))

    def step(t, h):
        gi_t = gi_scr[t]                                  # (BB, 3*Hp) f32
        gh = jnp.dot(h.astype(w_hh.dtype), w_hh,
                     preferred_element_type=jnp.float32)  # (BB, 3*Hp)
        # Hp is a multiple of 128 -> these column slices are lane-tile aligned.
        i_r, i_z, i_n = gi_t[:, 0:hp], gi_t[:, hp:2 * hp], gi_t[:, 2 * hp:3 * hp]
        h_r, h_z, h_n = gh[:, 0:hp], gh[:, hp:2 * hp], gh[:, 2 * hp:3 * hp]
        r = jax.nn.sigmoid(i_r + h_r)
        z = jax.nn.sigmoid(i_z + h_z)
        n = jnp.tanh(i_n + r * (h_n + b_hn))
        h_new = (1.0 - z) * n + z * h
        out_ref[t] = h_new.astype(out_ref.dtype)
        return h_new

    h_scr[...] = jax.lax.fori_loop(0, ts, step, h_scr[...], unroll=unroll)


@functools.partial(jax.jit, static_argnames=("chunk",))
def gru_forward(h0, x, w_ih, w_hh, b_ih, b_hh, *, chunk=64):
    """Single-layer unidirectional GRU.

    h0:   (1, B, H)    x: (T, B, D)
    w_ih: (D, 3H)      w_hh: (H, 3H)      (gate order r, z, n; pre-transposed)
    b_ih: (1, 3H)      b_hh: (1, 3H)
    Returns (hidden_t, output) like EncoderRNN.forward.
    """
    T, B, D = x.shape
    H = h0.shape[-1]

    stream_dtype = w_hh.dtype            # bf16 by default (f32 also supported)
    store_dtype = stream_dtype           # outputs stored narrow, upcast in wrapper
    out_dtype = x.dtype

    Hp = _round_up(H, 128)               # lane-aligned hidden size (per gate)
    Dp = _round_up(D, 8)                 # sublane-aligned input size
    min_item = min(jnp.dtype(stream_dtype).itemsize, jnp.dtype(store_dtype).itemsize)
    subl = 8 * max(1, 4 // int(min_item))          # 16 for bf16, 8 for f32
    Bp = _round_up(B, subl)

    # Split batch across TensorCores when the chip has >1 (v7x / megacore).
    nbb = 2 if (_num_tensorcores() >= 2 and Bp % (2 * subl) == 0) else 1
    BB = Bp // nbb

    # ---- derive chunk size TS from per-generation VMEM capacity -------------
    sb = jnp.dtype(stream_dtype).itemsize
    ob = jnp.dtype(store_dtype).itemsize
    fixed = (2 * (Dp + Hp) * 3 * Hp * sb       # w_ih, w_hh (double-buffered)
             + 2 * 4 * Hp * 4                  # b_gi (3Hp) + b_hn (Hp), f32, x2
             + 2 * BB * Hp * 4                 # h0 block (f32, double-buffered)
             + BB * Hp * 4)                    # h_scratch
    per_ts = (2 * BB * Dp * sb                 # x chunk (double-buffered)
              + 2 * BB * Hp * ob               # out chunk (double-buffered)
              + 2 * BB * 3 * Hp * 4)           # gi scratch + its f32 transient
    vmem_cap = _tpu_vmem_bytes()
    ts_budget = max(1, (int(0.75 * vmem_cap) - fixed) // per_ts)
    ts_cap = max(1, min(chunk, ts_budget, T))
    nT = -(-T // ts_cap)                       # number of time chunks
    TS = -(-T // nT)                           # balanced chunk, minimal padding
    Tp = nT * TS

    need = fixed + TS * per_ts
    vmem_limit = int(min(vmem_cap, max(need + (8 << 20), 32 << 20)))

    # ---- pad parameters (per-gate on the 3H axis) ----------------------------
    w_ih_p = jnp.pad(_pad_gate_cols(w_ih, H, Hp),
                     ((0, Dp - D), (0, 0))).astype(stream_dtype)          # (Dp, 3Hp)
    w_hh_p = jnp.pad(_pad_gate_cols(w_hh, H, Hp),
                     ((0, Hp - H), (0, 0))).astype(stream_dtype)          # (Hp, 3Hp)
    b_ih3 = jnp.pad(b_ih.astype(jnp.float32).reshape(3, H), ((0, 0), (0, Hp - H)))
    b_hh3 = jnp.pad(b_hh.astype(jnp.float32).reshape(3, H), ((0, 0), (0, Hp - H)))
    # Exact fold: r/z recurrent biases move into the input-side bias; only the
    # n-gate recurrent bias stays inside the r * (h @ W_hn + b_hn) term.
    b_gi = (b_ih3 + b_hh3 * jnp.array([[1.0], [1.0], [0.0]], jnp.float32)
            ).reshape(1, 3 * Hp)                                          # (1, 3Hp)
    b_hn = b_hh3[2:3]                                                     # (1, Hp)

    # Padded batch rows evolve a nonzero hidden state (gi = bias) but are always
    # sliced off below; padded hidden lanes stay exactly 0 by construction.
    x_p = jnp.pad(x, ((0, Tp - T), (0, Bp - B), (0, Dp - D))).astype(stream_dtype)
    h0_p = jnp.pad(h0, ((0, 0), (0, Bp - B), (0, Hp - H))).astype(jnp.float32)

    kernel = functools.partial(_gru_chunk_kernel, hidden_pad=Hp, chunk=TS,
                               unroll=min(8, TS))

    out_p = pl.pallas_call(
        kernel,
        out_shape=jax.ShapeDtypeStruct((Tp, Bp, Hp), store_dtype),
        grid_spec=pltpu.PrefetchScalarGridSpec(
            num_scalar_prefetch=0,
            grid=(nbb, Tp // TS),                    # (batch blocks, time chunks)
            in_specs=[
                pl.BlockSpec((TS, BB, Dp), lambda b, s: (s, b, 0)),    # x chunk
                pl.BlockSpec((Dp, 3 * Hp), lambda b, s: (0, 0)),       # w_ih (invariant)
                pl.BlockSpec((1, 3 * Hp), lambda b, s: (0, 0)),        # b_gi (invariant)
                pl.BlockSpec((Hp, 3 * Hp), lambda b, s: (0, 0)),       # w_hh (invariant)
                pl.BlockSpec((1, Hp), lambda b, s: (0, 0)),            # b_hn (invariant)
                pl.BlockSpec((1, BB, Hp), lambda b, s: (0, b, 0)),     # h0
            ],
            out_specs=pl.BlockSpec((TS, BB, Hp), lambda b, s: (s, b, 0)),
            scratch_shapes=[
                pltpu.VMEM((TS, BB, 3 * Hp), jnp.float32),   # per-chunk gi
                pltpu.VMEM((BB, Hp), jnp.float32),           # carried hidden state
            ],
        ),
        compiler_params=pltpu.CompilerParams(
            # batch blocks are independent -> parallel (v7x / megacore);
            # the time recurrence must run sequentially -> arbitrary.
            dimension_semantics=("parallel", "arbitrary"),
            vmem_limit_bytes=vmem_limit,
        ),
    )(x_p, w_ih_p, b_gi, w_hh_p, b_hn, h0_p)

    output = out_p[:T, :B, :H].astype(out_dtype)
    hidden_t = output[T - 1:T]                    # final hidden == last output row
    return hidden_t, output


def gru_reference(h0, x, w_ih, w_hh, b_ih, b_hh):
    """Pure-JAX f32 reference (same parameter values) for validation."""
    H = h0.shape[-1]
    w_ih = w_ih.astype(jnp.float32)
    w_hh = w_hh.astype(jnp.float32)
    b_ih = b_ih.astype(jnp.float32)
    b_hh = b_hh.astype(jnp.float32)

    def step(h, x_t):
        gi = x_t @ w_ih + b_ih
        gh = h @ w_hh + b_hh
        r = jax.nn.sigmoid(gi[:, :H] + gh[:, :H])
        z = jax.nn.sigmoid(gi[:, H:2 * H] + gh[:, H:2 * H])
        n = jnp.tanh(gi[:, 2 * H:] + r * gh[:, 2 * H:])
        h_new = (1.0 - z) * n + z * h
        return h_new, h_new

    hT, out = jax.lax.scan(step, h0[0].astype(jnp.float32), x.astype(jnp.float32))
    return hT[None], out


class EncoderRNNPallas:
    """JAX/Pallas port of EncoderRNN (num_layers=1, bidirectional=False,
    input_embedding=None, dropout=0 -> identity at inference)."""

    def __init__(self, input_size, hidden_size, key, param_dtype=jnp.bfloat16):
        self.input_size = input_size
        self.hidden_size = hidden_size
        bound = 1.0 / float(hidden_size) ** 0.5
        k1, k2, k3, k4 = jax.random.split(key, 4)

        def u(k, shape):
            return jax.random.uniform(k, shape, jnp.float32, -bound, bound
                                      ).astype(param_dtype)

        # PyTorch stores weight_ih_l0 as (3H, D); we keep the transposed layout.
        self.w_ih = u(k1, (input_size, 3 * hidden_size))
        self.w_hh = u(k2, (hidden_size, 3 * hidden_size))
        self.b_ih = u(k3, (1, 3 * hidden_size))
        self.b_hh = u(k4, (1, 3 * hidden_size))

    def init_hidden(self, batch_size):
        return jnp.zeros((1, batch_size, self.hidden_size), jnp.float32)

    def __call__(self, hidden, inp, lengths=None):
        # TODO(synk): pack_padded_sequence / pad_packed_sequence (variable lengths)
        #             not implemented; assumes fully-dense sequences (lengths=None).
        # dropout_emb is identity (dropout=0 / eval mode); input_embedding is None.
        assert lengths is None, "variable-length sequences not supported"
        return gru_forward(hidden, inp, self.w_ih, self.w_hh, self.b_ih, self.b_hh)


if __name__ == "__main__":
    key = jax.random.PRNGKey(0)
    k_param, k_x, k_x2 = jax.random.split(key, 3)

    # --- main example (shapes implied by the module) -------------------------
    seq_len, batch, input_size, hidden_size = 8, 8, 16, 32

    enc = EncoderRNNPallas(input_size, hidden_size, k_param)
    x = jax.random.normal(k_x, (seq_len, batch, input_size), jnp.float32)
    h0 = enc.init_hidden(batch)

    hidden_t, output = enc(h0, x)
    jax.block_until_ready((hidden_t, output))

    assert hidden_t.shape == (1, batch, hidden_size)
    assert output.shape == (seq_len, batch, hidden_size)
    assert bool(jnp.all(jnp.isfinite(output)))

    # Loose check against a pure-JAX f32 reference (params / streaming are bf16).
    _, out_ref = gru_reference(h0, x, enc.w_ih, enc.w_hh, enc.b_ih, enc.b_hh)
    max_err = float(jnp.max(jnp.abs(output.astype(jnp.float32) - out_ref)))
    assert max_err < 0.1, f"max abs error vs reference: {max_err}"

    # --- second check: multi-chunk time grid, odd batch / input sizes --------
    T2, B2, D2 = 20, 5, 10
    enc2 = EncoderRNNPallas(D2, hidden_size, k_param)
    x2 = jax.random.normal(k_x2, (T2, B2, D2), jnp.float32)
    h02 = enc2.init_hidden(B2)
    hT2, out2 = gru_forward(h02, x2, enc2.w_ih, enc2.w_hh, enc2.b_ih, enc2.b_hh,
                            chunk=8)   # forces several time chunks + padding
    jax.block_until_ready((hT2, out2))
    _, out2_ref = gru_reference(h02, x2, enc2.w_ih, enc2.w_hh, enc2.b_ih, enc2.b_hh)
    err2 = float(jnp.max(jnp.abs(out2.astype(jnp.float32) - out2_ref)))
    assert out2.shape == (T2, B2, hidden_size)
    assert err2 < 0.1, f"max abs error vs reference (multi-chunk): {err2}"

    print("KERNEL_OK")
</pallas_src>

<mosaic_0001>
module attributes {stable_mosaic.version = 11 : i64} {
  func.func @_gru_chunk_kernel(%arg0: i32, %arg1: i32, %arg2: memref<8x16x16xbf16, #tpu.memory_space<vmem>>, %arg3: memref<16x384xbf16, #tpu.memory_space<vmem>>, %arg4: memref<1x384xf32, #tpu.memory_space<vmem>>, %arg5: memref<128x384xbf16, #tpu.memory_space<vmem>>, %arg6: memref<1x128xf32, #tpu.memory_space<vmem>>, %arg7: memref<1x16x128xf32, #tpu.memory_space<vmem>>, %arg8: memref<8x16x128xbf16, #tpu.memory_space<vmem>>, %arg9: memref<8x16x384xf32, #tpu.memory_space<vmem>>, %arg10: memref<16x128xf32, #tpu.memory_space<vmem>>) attributes {dimension_semantics = [#tpu.dimension_semantics<parallel>, #tpu.dimension_semantics<arbitrary>], iteration_bounds = array<i64: 1, 1>, scalar_prefetch = 0 : i64, scratch_operands = 2 : i64, tpu.core_type = #tpu.core_type<tc>, window_params = [{transform_indices = @transform_0, window_bounds = array<i64: 8, 16, 16>}, {pipeline_mode = #tpu.pipeline_mode<synchronous>, transform_indices = @transform_1, window_bounds = array<i64: 16, 384>}, {pipeline_mode = #tpu.pipeline_mode<synchronous>, transform_indices = @transform_2, window_bounds = array<i64: 1, 384>}, {pipeline_mode = #tpu.pipeline_mode<synchronous>, transform_indices = @transform_3, window_bounds = array<i64: 128, 384>}, {pipeline_mode = #tpu.pipeline_mode<synchronous>, transform_indices = @transform_4, window_bounds = array<i64: 1, 128>}, {transform_indices = @transform_5, window_bounds = array<i64: 1, 16, 128>}, {transform_indices = @transform_6, window_bounds = array<i64: 8, 16, 128>}]} {
    %c0_i32 = arith.constant 0 : i32
    %0 = arith.cmpi eq, %arg1, %c0_i32 : i32
    %1 = arith.extui %0 : i1 to i32
    %c0_i32_0 = arith.constant 0 : i32
    %2 = arith.cmpi ne, %1, %c0_i32_0 : i32
    scf.if %2 {
      %c0_83 = arith.constant 0 : index
      %c0_84 = arith.constant 0 : index
      %c0_85 = arith.constant 0 : index
      %314 = vector.load %arg7[%c0_83, %c0_84, %c0_85] : memref<1x16x128xf32, #tpu.memory_space<vmem>>, vector<1x16x128xf32>
      %315 = vector.shape_cast %314 : vector<1x16x128xf32> to vector<16x128xf32>
      %c0_86 = arith.constant 0 : index
      %c0_87 = arith.constant 0 : index
      %316 = vector.load %arg10[%c0_86, %c0_87] : memref<16x128xf32, #tpu.memory_space<vmem>>, vector<16x128xf32>
      tpu.vector_store %arg10[%c0_86, %c0_87], %315 {strides = array<i32>} : memref<16x128xf32, #tpu.memory_space<vmem>>, vector<16x128xf32>,
    } else {
    }
    %c0 = arith.constant 0 : index
    %c0_1 = arith.constant 0 : index
    %3 = vector.load %arg3[%c0, %c0_1] : memref<16x384xbf16, #tpu.memory_space<vmem>>, vector<16x384xbf16>
    %c0_2 = arith.constant 0 : index
    %c0_3 = arith.constant 0 : index
    %c0_4 = arith.constant 0 : index
    %4 = vector.load %arg2[%c0_2, %c0_3, %c0_4] : memref<8x16x16xbf16, #tpu.memory_space<vmem>>, vector<8x16x16xbf16>
    %5 = vector.shape_cast %4 : vector<8x16x16xbf16> to vector<128x16xbf16>
    %cst = arith.constant dense<0.000000e+00> : vector<128x384xf32>
    %6 = tpu.matmul %5, %3, %cst {dimension_numbers = #tpu.dot_dimension_numbers<[1], [0], [0], [1], [0, 0, 1, 1], [], []>} : vector<128x16xbf16>, vector<16x384xbf16>, vector<128x384xf32> -> vector<128x384xf32>
    %c0_5 = arith.constant 0 : index
    %c0_6 = arith.constant 0 : index
    %7 = vector.load %arg4[%c0_5, %c0_6] : memref<1x384xf32, #tpu.memory_space<vmem>>, vector<1x384xf32>
    %8 = vector.broadcast %7 : vector<1x384xf32> to vector<128x384xf32>
    %9 = arith.addf %6, %8 : vector<128x384xf32>
    %10 = vector.shape_cast %9 : vector<128x384xf32> to vector<8x16x384xf32>
    %c0_7 = arith.constant 0 : index
    %c0_8 = arith.constant 0 : index
    %c0_9 = arith.constant 0 : index
    %11 = vector.load %arg9[%c0_7, %c0_8, %c0_9] : memref<8x16x384xf32, #tpu.memory_space<vmem>>, vector<8x16x384xf32>
    tpu.vector_store %arg9[%c0_7, %c0_8, %c0_9], %10 {strides = array<i32>} : memref<8x16x384xf32, #tpu.memory_space<vmem>>, vector<8x16x384xf32>,
    %c0_10 = arith.constant 0 : index
    %c0_11 = arith.constant 0 : index
    %12 = vector.load %arg5[%c0_10, %c0_11] : memref<128x384xbf16, #tpu.memory_space<vmem>>, vector<128x384xbf16>
    %c0_12 = arith.constant 0 : index
    %c0_13 = arith.constant 0 : index
    %13 = vector.load %arg6[%c0_12, %c0_13] : memref<1x128xf32, #tpu.memory_space<vmem>>, vector<1x128xf32>
    %14 = vector.shape_cast %13 : vector<1x128xf32> to vector<1x128xf32>
    %15 = vector.broadcast %14 : vector<1x128xf32> to vector<16x128xf32>
    %c0_14 = arith.constant 0 : index
    %c0_15 = arith.constant 0 : index
    %16 = vector.load %arg10[%c0_14, %c0_15] : memref<16x128xf32, #tpu.memory_space<vmem>>, vector<16x128xf32>
    %c0_i32_16 = arith.constant 0 : i32
    %17 = arith.index_cast %c0_i32_16 : i32 to index
    %c0_17 = arith.constant 0 : index
    %c0_18 = arith.constant 0 : index
    %18 = vector.load %arg9[%17, %c0_17, %c0_18] : memref<8x16x384xf32, #tpu.memory_space<vmem>>, vector<1x16x384xf32>
    %19 = vector.shape_cast %18 : vector<1x16x384xf32> to vector<16x384xf32>
    %20 = arith.truncf %16 : vector<16x128xf32> to vector<16x128xbf16>
    %cst_19 = arith.constant dense<0.000000e+00> : vector<16x384xf32>
    %21 = tpu.matmul %20, %12, %cst_19 {dimension_numbers = #tpu.dot_dimension_numbers<[1], [0], [0], [1], [0, 0, 1, 1], [], []>} : vector<16x128xbf16>, vector<128x384xbf16>, vector<16x384xf32> -> vector<16x384xf32>
    %22 = vector.extract_strided_slice %19 {offsets = [0, 0], sizes = [16, 128], strides = [1, 1]} : vector<16x384xf32> to vector<16x128xf32>
    %23 = vector.extract_strided_slice %19 {offsets = [0, 128], sizes = [16, 128], strides = [1, 1]} : vector<16x384xf32> to vector<16x128xf32>
    %24 = vector.extract_strided_slice %19 {offsets = [0, 256], sizes = [16, 128], strides = [1, 1]} : vector<16x384xf32> to vector<16x128xf32>
    %25 = vector.extract_strided_slice %21 {offsets = [0, 0], sizes = [16, 128], strides = [1, 1]} : vector<16x384xf32> to vector<16x128xf32>
    %26 = vector.extract_strided_slice %21 {offsets = [0, 128], sizes = [16, 128], strides = [1, 1]} : vector<16x384xf32> to vector<16x128xf32>
    %27 = vector.extract_strided_slice %21 {offsets = [0, 256], sizes = [16, 128], strides = [1, 1]} : vector<16x384xf32> to vector<16x128xf32>
    %28 = arith.addf %22, %25 : vector<16x128xf32>
    %29 = arith.negf %28 : vector<16x128xf32>
    %30 = math.exp %29 : vector<16x128xf32>
    %cst_20 = arith.constant 1.000000e+00 : f32
    %31 = vector.broadcast %cst_20 : f32 to vector<16x128xf32>
    %32 = arith.addf %31, %30 : vector<16x128xf32>
    %33 = arith.divf %31, %32 : vector<16x128xf32>
    %34 = arith.addf %23, %26 : vector<16x128xf32>
    %35 = arith.negf %34 : vector<16x128xf32>
    %36 = math.exp %35 : vector<16x128xf32>
    %cst_21 = arith.constant 1.000000e+00 : f32
    %37 = vector.broadcast %cst_21 : f32 to vector<16x128xf32>
    %38 = arith.addf %37, %36 : vector<16x128xf32>
    %39 = arith.divf %37, %38 : vector<16x128xf32>
    %40 = arith.addf %27, %15 : vector<16x128xf32>
    %41 = arith.mulf %33, %40 : vector<16x128xf32>
    %42 = arith.addf %24, %41 : vector<16x128xf32>
    %43 = math.tanh %42 : vector<16x128xf32>
    %cst_22 = arith.constant 1.000000e+00 : f32
    %44 = vector.broadcast %cst_22 : f32 to vector<16x128xf32>
    %45 = arith.subf %44, %39 : vector<16x128xf32>
    %46 = arith.mulf %45, %43 : vector<16x128xf32>
    %47 = arith.mulf %39, %16 : vector<16x128xf32>
    %48 = arith.addf %46, %47 : vector<16x128xf32>
    %49 = arith.truncf %48 : vector<16x128xf32> to vector<16x128xbf16>
    %50 = arith.index_cast %c0_i32_16 : i32 to index
    %c0_23 = arith.constant 0 : index
    %c0_24 = arith.constant 0 : index
    %51 = vector.load %arg8[%50, %c0_23, %c0_24] : memref<8x16x128xbf16, #tpu.memory_space<vmem>>, vector<1x16x128xbf16>
    %52 = vector.shape_cast %51 : vector<1x16x128xbf16> to vector<16x128xbf16>
    %53 = vector.shape_cast %49 : vector<16x128xbf16> to vector<1x16x128xbf16>
    tpu.vector_store %arg8[%50, %c0_23, %c0_24], %53 {strides = array<i32>} : memref<8x16x128xbf16, #tpu.memory_space<vmem>>, vector<1x16x128xbf16>,
    %c1_i32 = arith.constant 1 : i32
    %54 = arith.index_cast %c1_i32 : i32 to index
    %c0_25 = arith.constant 0 : index
    %c0_26 = arith.constant 0 : index
    %55 = vector.load %arg9[%54, %c0_25, %c0_26] : memref<8x16x384xf32, #tpu.memory_space<vmem>>, vector<1x16x384xf32>
    %56 = vector.shape_cast %55 : vector<1x16x384xf32> to vector<16x384xf32>
    %57 = arith.truncf %48 : vector<16x128xf32> to vector<16x128xbf16>
    %cst_27 = arith.constant dense<0.000000e+00> : vector<16x384xf32>
    %58 = tpu.matmul %57, %12, %cst_27 {dimension_numbers = #tpu.dot_dimension_numbers<[1], [0], [0], [1], [0, 0, 1, 1], [], []>} : vector<16x128xbf16>, vector<128x384xbf16>, vector<16x384xf32> -> vector<16x384xf32>
    %59 = vector.extract_strided_slice %56 {offsets = [0, 0], sizes = [16, 128], strides = [1, 1]} : vector<16x384xf32> to vector<16x128xf32>
    %60 = vector.extract_strided_slice %56 {offsets = [0, 128], sizes = [16, 128], strides = [1, 1]} : vector<16x384xf32> to vector<16x128xf32>
    %61 = vector.extract_strided_slice %56 {offsets = [0, 256], sizes = [16, 128], strides = [1, 1]} : vector<16x384xf32> to vector<16x128xf32>
    %62 = vector.extract_strided_slice %58 {offsets = [0, 0], sizes = [16, 128], strides = [1, 1]} : vector<16x384xf32> to vector<16x128xf32>
    %63 = vector.extract_strided_slice %58 {offsets = [0, 128], sizes = [16, 128], strides = [1, 1]} : vector<16x384xf32> to vector<16x128xf32>
    %64 = vector.extract_strided_slice %58 {offsets = [0, 256], sizes = [16, 128], strides = [1, 1]} : vector<16x384xf32> to vector<16x128xf32>
    %65 = arith.addf %59, %62 : vector<16x128xf32>
    %66 = arith.negf %65 : vector<16x128xf32>
    %67 = math.exp %66 : vector<16x128xf32>
    %cst_28 = arith.constant 1.000000e+00 : f32
    %68 = vector.broadcast %cst_28 : f32 to vector<16x128xf32>
    %69 = arith.addf %68, %67 : vector<16x128xf32>
    %70 = arith.divf %68, %69 : vector<16x128xf32>
    %71 = arith.addf %60, %63 : vector<16x128xf32>
    %72 = arith.negf %71 : vector<16x128xf32>
    %73 = math.exp %72 : vector<16x128xf32>
    %cst_29 = arith.constant 1.000000e+00 : f32
    %74 = vector.broadcast %cst_29 : f32 to vector<16x128xf32>
    %75 = arith.addf %74, %73 : vector<16x128xf32>
    %76 = arith.divf %74, %75 : vector<16x128xf32>
    %77 = arith.addf %64, %15 : vector<16x128xf32>
    %78 = arith.mulf %70, %77 : vector<16x128xf32>
    %79 = arith.addf %61, %78 : vector<16x128xf32>
    %80 = math.tanh %79 : vector<16x128xf32>
    %cst_30 = arith.constant 1.000000e+00 : f32
    %81 = vector.broadcast %cst_30 : f32 to vector<16x128xf32>
    %82 = arith.subf %81, %76 : vector<16x128xf32>
    %83 = arith.mulf %82, %80 : vector<16x128xf32>
    %84 = arith.mulf %76, %48 : vector<16x128xf32>
    %85 = arith.addf %83, %84 : vector<16x128xf32>
    %86 = arith.truncf %85 : vector<16x128xf32> to vector<16x128xbf16>
    %87 = arith.index_cast %c1_i32 : i32 to index
    %c0_31 = arith.constant 0 : index
    %c0_32 = arith.constant 0 : index
    %88 = vector.load %arg8[%87, %c0_31, %c0_32] : memref<8x16x128xbf16, #tpu.memory_space<vmem>>, vector<1x16x128xbf16>
    %89 = vector.shape_cast %88 : vector<1x16x128xbf16> to vector<16x128xbf16>
    %90 = vector.shape_cast %86 : vector<16x128xbf16> to vector<1x16x128xbf16>
    tpu.vector_store %arg8[%87, %c0_31, %c0_32], %90 {strides = array<i32>} : memref<8x16x128xbf16, #tpu.memory_space<vmem>>, vector<1x16x128xbf16>,
    %c2_i32 = arith.constant 2 : i32
    %91 = arith.index_cast %c2_i32 : i32 to index
    %c0_33 = arith.constant 0 : index
    %c0_34 = arith.constant 0 : index
    %92 = vector.load %arg9[%91, %c0_33, %c0_34] : memref<8x16x384xf32, #tpu.memory_space<vmem>>, vector<1x16x384xf32>
    %93 = vector.shape_cast %92 : vector<1x16x384xf32> to vector<16x384xf32>
    %94 = arith.truncf %85 : vector<16x128xf32> to vector<16x128xbf16>
    %cst_35 = arith.constant dense<0.000000e+00> : vector<16x384xf32>
    %95 = tpu.matmul %94, %12, %cst_35 {dimension_numbers = #tpu.dot_dimension_numbers<[1], [0], [0], [1], [0, 0, 1, 1], [], []>} : vector<16x128xbf16>, vector<128x384xbf16>, vector<16x384xf32> -> vector<16x384xf32>
    %96 = vector.extract_strided_slice %93 {offsets = [0, 0], sizes = [16, 128], strides = [1, 1]} : vector<16x384xf32> to vector<16x128xf32>
    %97 = vector.extract_strided_slice %93 {offsets = [0, 128], sizes = [16, 128], strides = [1, 1]} : vector<16x384xf32> to vector<16x128xf32>
    %98 = vector.extract_strided_slice %93 {offsets = [0, 256], sizes = [16, 128], strides = [1, 1]} : vector<16x384xf32> to vector<16x128xf32>
    %99 = vector.extract_strided_slice %95 {offsets = [0, 0], sizes = [16, 128], strides = [1, 1]} : vector<16x384xf32> to vector<16x128xf32>
    %100 = vector.extract_strided_slice %95 {offsets = [0, 128], sizes = [16, 128], strides = [1, 1]} : vector<16x384xf32> to vector<16x128xf32>
    %101 = vector.extract_strided_slice %95 {offsets = [0, 256], sizes = [16, 128], strides = [1, 1]} : vector<16x384xf32> to vector<16x128xf32>
    %102 = arith.addf %96, %99 : vector<16x128xf32>
    %103 = arith.negf %102 : vector<16x128xf32>
    %104 = math.exp %103 : vector<16x128xf32>
    %cst_36 = arith.constant 1.000000e+00 : f32
    %105 = vector.broadcast %cst_36 : f32 to vector<16x128xf32>
    %106 = arith.addf %105, %104 : vector<16x128xf32>
    %107 = arith.divf %105, %106 : vector<16x128xf32>
    %108 = arith.addf %97, %100 : vector<16x128xf32>
    %109 = arith.negf %108 : vector<16x128xf32>
    %110 = math.exp %109 : vector<16x128xf32>
    %cst_37 = arith.constant 1.000000e+00 : f32
    %111 = vector.broadcast %cst_37 : f32 to vector<16x128xf32>
    %112 = arith.addf %111, %110 : vector<16x128xf32>
    %113 = arith.divf %111, %112 : vector<16x128xf32>
    %114 = arith.addf %101, %15 : vector<16x128xf32>
    %115 = arith.mulf %107, %114 : vector<16x128xf32>
    %116 = arith.addf %98, %115 : vector<16x128xf32>
    %117 = math.tanh %116 : vector<16x128xf32>
    %cst_38 = arith.constant 1.000000e+00 : f32
    %118 = vector.broadcast %cst_38 : f32 to vector<16x128xf32>
    %119 = arith.subf %118, %113 : vector<16x128xf32>
    %120 = arith.mulf %119, %117 : vector<16x128xf32>
    %121 = arith.mulf %113, %85 : vector<16x128xf32>
    %122 = arith.addf %120, %121 : vector<16x128xf32>
    %123 = arith.truncf %122 : vector<16x128xf32> to vector<16x128xbf16>
    %124 = arith.index_cast %c2_i32 : i32 to index
    %c0_39 = arith.constant 0 : index
    %c0_40 = arith.constant 0 : index
    %125 = vector.load %arg8[%124, %c0_39, %c0_40] : memref<8x16x128xbf16, #tpu.memory_space<vmem>>, vector<1x16x128xbf16>
    %126 = vector.shape_cast %125 : vector<1x16x128xbf16> to vector<16x128xbf16>
    %127 = vector.shape_cast %123 : vector<16x128xbf16> to vector<1x16x128xbf16>
    tpu.vector_store %arg8[%124, %c0_39, %c0_40], %127 {strides = array<i32>} : memref<8x16x128xbf16, #tpu.memory_space<vmem>>, vector<1x16x128xbf16>,
    %c3_i32 = arith.constant 3 : i32
    %128 = arith.index_cast %c3_i32 : i32 to index
    %c0_41 = arith.constant 0 : index
    %c0_42 = arith.constant 0 : index
    %129 = vector.load %arg9[%128, %c0_41, %c0_42] : memref<8x16x384xf32, #tpu.memory_space<vmem>>, vector<1x16x384xf32>
    %130 = vector.shape_cast %129 : vector<1x16x384xf32> to vector<16x384xf32>
    %131 = arith.truncf %122 : vector<16x128xf32> to vector<16x128xbf16>
    %cst_43 = arith.constant dense<0.000000e+00> : vector<16x384xf32>
    %132 = tpu.matmul %131, %12, %cst_43 {dimension_numbers = #tpu.dot_dimension_numbers<[1], [0], [0], [1], [0, 0, 1, 1], [], []>} : vector<16x128xbf16>, vector<128x384xbf16>, vector<16x384xf32> -> vector<16x384xf32>
    %133 = vector.extract_strided_slice %130 {offsets = [0, 0], sizes = [16, 128], strides = [1, 1]} : vector<16x384xf32> to vector<16x128xf32>
    %134 = vector.extract_strided_slice %130 {offsets = [0, 128], sizes = [16, 128], strides = [1, 1]} : vector<16x384xf32> to vector<16x128xf32>
    %135 = vector.extract_strided_slice %130 {offsets = [0, 256], sizes = [16, 128], strides = [1, 1]} : vector<16x384xf32> to vector<16x128xf32>
    %136 = vector.extract_strided_slice %132 {offsets = [0, 0], sizes = [16, 128], strides = [1, 1]} : vector<16x384xf32> to vector<16x128xf32>
    %137 = vector.extract_strided_slice %132 {offsets = [0, 128], sizes = [16, 128], strides = [1, 1]} : vector<16x384xf32> to vector<16x128xf32>
    %138 = vector.extract_strided_slice %132 {offsets = [0, 256], sizes = [16, 128], strides = [1, 1]} : vector<16x384xf32> to vector<16x128xf32>
    %139 = arith.addf %133, %136 : vector<16x128xf32>
    %140 = arith.negf %139 : vector<16x128xf32>
    %141 = math.exp %140 : vector<16x128xf32>
    %cst_44 = arith.constant 1.000000e+00 : f32
    %142 = vector.broadcast %cst_44 : f32 to vector<16x128xf32>
    %143 = arith.addf %142, %141 : vector<16x128xf32>
    %144 = arith.divf %142, %143 : vector<16x128xf32>
    %145 = arith.addf %134, %137 : vector<16x128xf32>
    %146 = arith.negf %145 : vector<16x128xf32>
    %147 = math.exp %146 : vector<16x128xf32>
    %cst_45 = arith.constant 1.000000e+00 : f32
    %148 = vector.broadcast %cst_45 : f32 to vector<16x128xf32>
    %149 = arith.addf %148, %147 : vector<16x128xf32>
    %150 = arith.divf %148, %149 : vector<16x128xf32>
    %151 = arith.addf %138, %15 : vector<16x128xf32>
    %152 = arith.mulf %144, %151 : vector<16x128xf32>
    %153 = arith.addf %135, %152 : vector<16x128xf32>
    %154 = math.tanh %153 : vector<16x128xf32>
    %cst_46 = arith.constant 1.000000e+00 : f32
    %155 = vector.broadcast %cst_46 : f32 to vector<16x128xf32>
    %156 = arith.subf %155, %150 : vector<16x128xf32>
    %157 = arith.mulf %156, %154 : vector<16x128xf32>
    %158 = arith.mulf %150, %122 : vector<16x128xf32>
    %159 = arith.addf %157, %158 : vector<16x128xf32>
    %160 = arith.truncf %159 : vector<16x128xf32> to vector<16x128xbf16>
    %161 = arith.index_cast %c3_i32 : i32 to index
    %c0_47 = arith.constant 0 : index
    %c0_48 = arith.constant 0 : index
    %162 = vector.load %arg8[%161, %c0_47, %c0_48] : memref<8x16x128xbf16, #tpu.memory_space<vmem>>, vector<1x16x128xbf16>
    %163 = vector.shape_cast %162 : vector<1x16x128xbf16> to vector<16x128xbf16>
    %164 = vector.shape_cast %160 : vector<16x128xbf16> to vector<1x16x128xbf16>
    tpu.vector_store %arg8[%161, %c0_47, %c0_48], %164 {strides = array<i32>} : memref<8x16x128xbf16, #tpu.memory_space<vmem>>, vector<1x16x128xbf16>,
    %c4_i32 = arith.constant 4 : i32
    %165 = arith.index_cast %c4_i32 : i32 to index
    %c0_49 = arith.constant 0 : index
    %c0_50 = arith.constant 0 : index
    %166 = vector.load %arg9[%165, %c0_49, %c0_50] : memref<8x16x384xf32, #tpu.memory_space<vmem>>, vector<1x16x384xf32>
    %167 = vector.shape_cast %166 : vector<1x16x384xf32> to vector<16x384xf32>
    %168 = arith.truncf %159 : vector<16x128xf32> to vector<16x128xbf16>
    %cst_51 = arith.constant dense<0.000000e+00> : vector<16x384xf32>
    %169 = tpu.matmul %168, %12, %cst_51 {dimension_numbers = #tpu.dot_dimension_numbers<[1], [0], [0], [1], [0, 0, 1, 1], [], []>} : vector<16x128xbf16>, vector<128x384xbf16>, vector<16x384xf32> -> vector<16x384xf32>
    %170 = vector.extract_strided_slice %167 {offsets = [0, 0], sizes = [16, 128], strides = [1, 1]} : vector<16x384xf32> to vector<16x128xf32>
    %171 = vector.extract_strided_slice %167 {offsets = [0, 128], sizes = [16, 128], strides = [1, 1]} : vector<16x384xf32> to vector<16x128xf32>
    %172 = vector.extract_strided_slice %167 {offsets = [0, 256], sizes = [16, 128], strides = [1, 1]} : vector<16x384xf32> to vector<16x128xf32>
    %173 = vector.extract_strided_slice %169 {offsets = [0, 0], sizes = [16, 128], strides = [1, 1]} : vector<16x384xf32> to vector<16x128xf32>
    %174 = vector.extract_strided_slice %169 {offsets = [0, 128], sizes = [16, 128], strides = [1, 1]} : vector<16x384xf32> to vector<16x128xf32>
    %175 = vector.extract_strided_slice %169 {offsets = [0, 256], sizes = [16, 128], strides = [1, 1]} : vector<16x384xf32> to vector<16x128xf32>
    %176 = arith.addf %170, %173 : vector<16x128xf32>
    %177 = arith.negf %176 : vector<16x128xf32>
    %178 = math.exp %177 : vector<16x128xf32>
    %cst_52 = arith.constant 1.000000e+00 : f32
    %179 = vector.broadcast %cst_52 : f32 to vector<16x128xf32>
    %180 = arith.addf %179, %178 : vector<16x128xf32>
    %181 = arith.divf %179, %180 : vector<16x128xf32>
    %182 = arith.addf %171, %174 : vector<16x128xf32>
    %183 = arith.negf %182 : vector<16x128xf32>
    %184 = math.exp %183 : vector<16x128xf32>
    %cst_53 = arith.constant 1.000000e+00 : f32
    %185 = vector.broadcast %cst_53 : f32 to vector<16x128xf32>
    %186 = arith.addf %185, %184 : vector<16x128xf32>
    %187 = arith.divf %185, %186 : vector<16x128xf32>
    %188 = arith.addf %175, %15 : vector<16x128xf32>
    %189 = arith.mulf %181, %188 : vector<16x128xf32>
    %190 = arith.addf %172, %189 : vector<16x128xf32>
    %191 = math.tanh %190 : vector<16x128xf32>
    %cst_54 = arith.constant 1.000000e+00 : f32
    %192 = vector.broadcast %cst_54 : f32 to vector<16x128xf32>
    %193 = arith.subf %192, %187 : vector<16x128xf32>
    %194 = arith.mulf %193, %191 : vector<16x128xf32>
    %195 = arith.mulf %187, %159 : vector<16x128xf32>
    %196 = arith.addf %194, %195 : vector<16x128xf32>
    %197 = arith.truncf %196 : vector<16x128xf32> to vector<16x128xbf16>
    %198 = arith.index_cast %c4_i32 : i32 to index
    %c0_55 = arith.constant 0 : index
    %c0_56 = arith.constant 0 : index
    %199 = vector.load %arg8[%198, %c0_55, %c0_56] : memref<8x16x128xbf16, #tpu.memory_space<vmem>>, vector<1x16x128xbf16>
    %200 = vector.shape_cast %199 : vector<1x16x128xbf16> to vector<16x128xbf16>
    %201 = vector.shape_cast %197 : vector<16x128xbf16> to vector<1x16x128xbf16>
    tpu.vector_store %arg8[%198, %c0_55, %c0_56], %201 {strides = array<i32>} : memref<8x16x128xbf16, #tpu.memory_space<vmem>>, vector<1x16x128xbf16>,
    %c5_i32 = arith.constant 5 : i32
    %202 = arith.index_cast %c5_i32 : i32 to index
    %c0_57 = arith.constant 0 : index
    %c0_58 = arith.constant 0 : index
    %203 = vector.load %arg9[%202, %c0_57, %c0_58] : memref<8x16x384xf32, #tpu.memory_space<vmem>>, vector<1x16x384xf32>
    %204 = vector.shape_cast %203 : vector<1x16x384xf32> to vector<16x384xf32>
    %205 = arith.truncf %196 : vector<16x128xf32> to vector<16x128xbf16>
    %cst_59 = arith.constant dense<0.000000e+00> : vector<16x384xf32>
    %206 = tpu.matmul %205, %12, %cst_59 {dimension_numbers = #tpu.dot_dimension_numbers<[1], [0], [0], [1], [0, 0, 1, 1], [], []>} : vector<16x128xbf16>, vector<128x384xbf16>, vector<16x384xf32> -> vector<16x384xf32>
    %207 = vector.extract_strided_slice %204 {offsets = [0, 0], sizes = [16, 128], strides = [1, 1]} : vector<16x384xf32> to vector<16x128xf32>
    %208 = vector.extract_strided_slice %204 {offsets = [0, 128], sizes = [16, 128], strides = [1, 1]} : vector<16x384xf32> to vector<16x128xf32>
    %209 = vector.extract_strided_slice %204 {offsets = [0, 256], sizes = [16, 128], strides = [1, 1]} : vector<16x384xf32> to vector<16x128xf32>
    %210 = vector.extract_strided_slice %206 {offsets = [0, 0], sizes = [16, 128], strides = [1, 1]} : vector<16x384xf32> to vector<16x128xf32>
    %211 = vector.extract_strided_slice %206 {offsets = [0, 128], sizes = [16, 128], strides = [1, 1]} : vector<16x384xf32> to vector<16x128xf32>
    %212 = vector.extract_strided_slice %206 {offsets = [0, 256], sizes = [16, 128], strides = [1, 1]} : vector<16x384xf32> to vector<16x128xf32>
    %213 = arith.addf %207, %210 : vector<16x128xf32>
    %214 = arith.negf %213 : vector<16x128xf32>
    %215 = math.exp %214 : vector<16x128xf32>
    %cst_60 = arith.constant 1.000000e+00 : f32
    %216 = vector.broadcast %cst_60 : f32 to vector<16x128xf32>
    %217 = arith.addf %216, %215 : vector<16x128xf32>
    %218 = arith.divf %216, %217 : vector<16x128xf32>
    %219 = arith.addf %208, %211 : vector<16x128xf32>
    %220 = arith.negf %219 : vector<16x128xf32>
    %221 = math.exp %220 : vector<16x128xf32>
    %cst_61 = arith.constant 1.000000e+00 : f32
    %222 = vector.broadcast %cst_61 : f32 to vector<16x128xf32>
    %223 = arith.addf %222, %221 : vector<16x128xf32>
    %224 = arith.divf %222, %223 : vector<16x128xf32>
    %225 = arith.addf %212, %15 : vector<16x128xf32>
    %226 = arith.mulf %218, %225 : vector<16x128xf32>
    %227 = arith.addf %209, %226 : vector<16x128xf32>
    %228 = math.tanh %227 : vector<16x128xf32>
    %cst_62 = arith.constant 1.000000e+00 : f32
    %229 = vector.broadcast %cst_62 : f32 to vector<16x128xf32>
    %230 = arith.subf %229, %224 : vector<16x128xf32>
    %231 = arith.mulf %230, %228 : vector<16x128xf32>
    %232 = arith.mulf %224, %196 : vector<16x128xf32>
    %233 = arith.addf %231, %232 : vector<16x128xf32>
    %234 = arith.truncf %233 : vector<16x128xf32> to vector<16x128xbf16>
    %235 = arith.index_cast %c5_i32 : i32 to index
    %c0_63 = arith.constant 0 : index
    %c0_64 = arith.constant 0 : index
    %236 = vector.load %arg8[%235, %c0_63, %c0_64] : memref<8x16x128xbf16, #tpu.memory_space<vmem>>, vector<1x16x128xbf16>
    %237 = vector.shape_cast %236 : vector<1x16x128xbf16> to vector<16x128xbf16>
    %238 = vector.shape_cast %234 : vector<16x128xbf16> to vector<1x16x128xbf16>
    tpu.vector_store %arg8[%235, %c0_63, %c0_64], %238 {strides = array<i32>} : memref<8x16x128xbf16, #tpu.memory_space<vmem>>, vector<1x16x128xbf16>,
    %c6_i32 = arith.constant 6 : i32
    %239 = arith.index_cast %c6_i32 : i32 to index
    %c0_65 = arith.constant 0 : index
    %c0_66 = arith.constant 0 : index
    %240 = vector.load %arg9[%239, %c0_65, %c0_66] : memref<8x16x384xf32, #tpu.memory_space<vmem>>, vector<1x16x384xf32>
    %241 = vector.shape_cast %240 : vector<1x16x384xf32> to vector<16x384xf32>
    %242 = arith.truncf %233 : vector<16x128xf32> to vector<16x128xbf16>
    %cst_67 = arith.constant dense<0.000000e+00> : vector<16x384xf32>
    %243 = tpu.matmul %242, %12, %cst_67 {dimension_numbers = #tpu.dot_dimension_numbers<[1], [0], [0], [1], [0, 0, 1, 1], [], []>} : vector<16x128xbf16>, vector<128x384xbf16>, vector<16x384xf32> -> vector<16x384xf32>
    %244 = vector.extract_strided_slice %241 {offsets = [0, 0], sizes = [16, 128], strides = [1, 1]} : vector<16x384xf32> to vector<16x128xf32>
    %245 = vector.extract_strided_slice %241 {offsets = [0, 128], sizes = [16, 128], strides = [1, 1]} : vector<16x384xf32> to vector<16x128xf32>
    %246 = vector.extract_strided_slice %241 {offsets = [0, 256], sizes = [16, 128], strides = [1, 1]} : vector<16x384xf32> to vector<16x128xf32>
    %247 = vector.extract_strided_slice %243 {offsets = [0, 0], sizes = [16, 128], strides = [1, 1]} : vector<16x384xf32> to vector<16x128xf32>
    %248 = vector.extract_strided_slice %243 {offsets = [0, 128], sizes = [16, 128], strides = [1, 1]} : vector<16x384xf32> to vector<16x128xf32>
    %249 = vector.extract_strided_slice %243 {offsets = [0, 256], sizes = [16, 128], strides = [1, 1]} : vector<16x384xf32> to vector<16x128xf32>
    %250 = arith.addf %244, %247 : vector<16x128xf32>
    %251 = arith.negf %250 : vector<16x128xf32>
    %252 = math.exp %251 : vector<16x128xf32>
    %cst_68 = arith.constant 1.000000e+00 : f32
    %253 = vector.broadcast %cst_68 : f32 to vector<16x128xf32>
    %254 = arith.addf %253, %252 : vector<16x128xf32>
    %255 = arith.divf %253, %254 : vector<16x128xf32>
    %256 = arith.addf %245, %248 : vector<16x128xf32>
    %257 = arith.negf %256 : vector<16x128xf32>
    %258 = math.exp %257 : vector<16x128xf32>
    %cst_69 = arith.constant 1.000000e+00 : f32
    %259 = vector.broadcast %cst_69 : f32 to vector<16x128xf32>
    %260 = arith.addf %259, %258 : vector<16x128xf32>
    %261 = arith.divf %259, %260 : vector<16x128xf32>
    %262 = arith.addf %249, %15 : vector<16x128xf32>
    %263 = arith.mulf %255, %262 : vector<16x128xf32>
    %264 = arith.addf %246, %263 : vector<16x128xf32>
    %265 = math.tanh %264 : vector<16x128xf32>
    %cst_70 = arith.constant 1.000000e+00 : f32
    %266 = vector.broadcast %cst_70 : f32 to vector<16x128xf32>
    %267 = arith.subf %266, %261 : vector<16x128xf32>
    %268 = arith.mulf %267, %265 : vector<16x128xf32>
    %269 = arith.mulf %261, %233 : vector<16x128xf32>
    %270 = arith.addf %268, %269 : vector<16x128xf32>
    %271 = arith.truncf %270 : vector<16x128xf32> to vector<16x128xbf16>
    %272 = arith.index_cast %c6_i32 : i32 to index
    %c0_71 = arith.constant 0 : index
    %c0_72 = arith.constant 0 : index
    %273 = vector.load %arg8[%272, %c0_71, %c0_72] : memref<8x16x128xbf16, #tpu.memory_space<vmem>>, vector<1x16x128xbf16>
    %274 = vector.shape_cast %273 : vector<1x16x128xbf16> to vector<16x128xbf16>
    %275 = vector.shape_cast %271 : vector<16x128xbf16> to vector<1x16x128xbf16>
    tpu.vector_store %arg8[%272, %c0_71, %c0_72], %275 {strides = array<i32>} : memref<8x16x128xbf16, #tpu.memory_space<vmem>>, vector<1x16x128xbf16>,
    %c7_i32 = arith.constant 7 : i32
    %276 = arith.index_cast %c7_i32 : i32 to index
    %c0_73 = arith.constant 0 : index
    %c0_74 = arith.constant 0 : index
    %277 = vector.load %arg9[%276, %c0_73, %c0_74] : memref<8x16x384xf32, #tpu.memory_space<vmem>>, vector<1x16x384xf32>
    %278 = vector.shape_cast %277 : vector<1x16x384xf32> to vector<16x384xf32>
    %279 = arith.truncf %270 : vector<16x128xf32> to vector<16x128xbf16>
    %cst_75 = arith.constant dense<0.000000e+00> : vector<16x384xf32>
    %280 = tpu.matmul %279, %12, %cst_75 {dimension_numbers = #tpu.dot_dimension_numbers<[1], [0], [0], [1], [0, 0, 1, 1], [], []>} : vector<16x128xbf16>, vector<128x384xbf16>, vector<16x384xf32> -> vector<16x384xf32>
    %281 = vector.extract_strided_slice %278 {offsets = [0, 0], sizes = [16, 128], strides = [1, 1]} : vector<16x384xf32> to vector<16x128xf32>
    %282 = vector.extract_strided_slice %278 {offsets = [0, 128], sizes = [16, 128], strides = [1, 1]} : vector<16x384xf32> to vector<16x128xf32>
    %283 = vector.extract_strided_slice %278 {offsets = [0, 256], sizes = [16, 128], strides = [1, 1]} : vector<16x384xf32> to vector<16x128xf32>
    %284 = vector.extract_strided_slice %280 {offsets = [0, 0], sizes = [16, 128], strides = [1, 1]} : vector<16x384xf32> to vector<16x128xf32>
    %285 = vector.extract_strided_slice %280 {offsets = [0, 128], sizes = [16, 128], strides = [1, 1]} : vector<16x384xf32> to vector<16x128xf32>
    %286 = vector.extract_strided_slice %280 {offsets = [0, 256], sizes = [16, 128], strides = [1, 1]} : vector<16x384xf32> to vector<16x128xf32>
    %287 = arith.addf %281, %284 : vector<16x128xf32>
    %288 = arith.negf %287 : vector<16x128xf32>
    %289 = math.exp %288 : vector<16x128xf32>
    %cst_76 = arith.constant 1.000000e+00 : f32
    %290 = vector.broadcast %cst_76 : f32 to vector<16x128xf32>
    %291 = arith.addf %290, %289 : vector<16x128xf32>
    %292 = arith.divf %290, %291 : vector<16x128xf32>
    %293 = arith.addf %282, %285 : vector<16x128xf32>
    %294 = arith.negf %293 : vector<16x128xf32>
    %295 = math.exp %294 : vector<16x128xf32>
    %cst_77 = arith.constant 1.000000e+00 : f32
    %296 = vector.broadcast %cst_77 : f32 to vector<16x128xf32>
    %297 = arith.addf %296, %295 : vector<16x128xf32>
    %298 = arith.divf %296, %297 : vector<16x128xf32>
    %299 = arith.addf %286, %15 : vector<16x128xf32>
    %300 = arith.mulf %292, %299 : vector<16x128xf32>
    %301 = arith.addf %283, %300 : vector<16x128xf32>
    %302 = math.tanh %301 : vector<16x128xf32>
    %cst_78 = arith.constant 1.000000e+00 : f32
    %303 = vector.broadcast %cst_78 : f32 to vector<16x128xf32>
    %304 = arith.subf %303, %298 : vector<16x128xf32>
    %305 = arith.mulf %304, %302 : vector<16x128xf32>
    %306 = arith.mulf %298, %270 : vector<16x128xf32>
    %307 = arith.addf %305, %306 : vector<16x128xf32>
    %308 = arith.truncf %307 : vector<16x128xf32> to vector<16x128xbf16>
    %309 = arith.index_cast %c7_i32 : i32 to index
    %c0_79 = arith.constant 0 : index
    %c0_80 = arith.constant 0 : index
    %310 = vector.load %arg8[%309, %c0_79, %c0_80] : memref<8x16x128xbf16, #tpu.memory_space<vmem>>, vector<1x16x128xbf16>
    %311 = vector.shape_cast %310 : vector<1x16x128xbf16> to vector<16x128xbf16>
    %312 = vector.shape_cast %308 : vector<16x128xbf16> to vector<1x16x128xbf16>
    tpu.vector_store %arg8[%309, %c0_79, %c0_80], %312 {strides = array<i32>} : memref<8x16x128xbf16, #tpu.memory_space<vmem>>, vector<1x16x128xbf16>,
    %c8_i32 = arith.constant 8 : i32
    %c0_81 = arith.constant 0 : index
    %c0_82 = arith.constant 0 : index
    %313 = vector.load %arg10[%c0_81, %c0_82] : memref<16x128xf32, #tpu.memory_space<vmem>>, vector<16x128xf32>
    tpu.vector_store %arg10[%c0_81, %c0_82], %307 {strides = array<i32>} : memref<16x128xf32, #tpu.memory_space<vmem>>, vector<16x128xf32>,
    return
  }
  func.func @transform_0(%arg0: i32, %arg1: i32) -> (i32, i32, i32) {
    %c0_i32 = arith.constant 0 : i32
    %c0_i32_0 = arith.constant 0 : i32
    return %arg1, %arg0, %c0_i32 : i32, i32, i32
  }
  func.func @transform_1(%arg0: i32, %arg1: i32) -> (i32, i32) {
    %c0_i32 = arith.constant 0 : i32
    %c0_i32_0 = arith.constant 0 : i32
    %c0_i32_1 = arith.constant 0 : i32
    return %c0_i32, %c0_i32_0 : i32, i32
  }
  func.func @transform_2(%arg0: i32, %arg1: i32) -> (i32, i32) {
    %c0_i32 = arith.constant 0 : i32
    %c0_i32_0 = arith.constant 0 : i32
    %c0_i32_1 = arith.constant 0 : i32
    return %c0_i32, %c0_i32_0 : i32, i32
  }
  func.func @transform_3(%arg0: i32, %arg1: i32) -> (i32, i32) {
    %c0_i32 = arith.constant 0 : i32
    %c0_i32_0 = arith.constant 0 : i32
    %c0_i32_1 = arith.constant 0 : i32
    return %c0_i32, %c0_i32_0 : i32, i32
  }
  func.func @transform_4(%arg0: i32, %arg1: i32) -> (i32, i32) {
    %c0_i32 = arith.constant 0 : i32
    %c0_i32_0 = arith.constant 0 : i32
    %c0_i32_1 = arith.constant 0 : i32
    return %c0_i32, %c0_i32_0 : i32, i32
  }
  func.func @transform_5(%arg0: i32, %arg1: i32) -> (i32, i32, i32) {
    %c0_i32 = arith.constant 0 : i32
    %c0_i32_0 = arith.constant 0 : i32
    %c0_i32_1 = arith.constant 0 : i32
    return %c0_i32, %arg0, %c0_i32_0 : i32, i32, i32
  }
  func.func @transform_6(%arg0: i32, %arg1: i32) -> (i32, i32, i32) {
    %c0_i32 = arith.constant 0 : i32
    %c0_i32_0 = arith.constant 0 : i32
    return %arg1, %arg0, %c0_i32 : i32, i32, i32
  }
}

</mosaic_0001>

<bundles_post_ra>
// kernel: gru_forward.1
= control target key start
LH: loop header
LB: loop body
LE: loop exit
PB: predicated region body
PF: predicated region fallthrough
CT: control target
= control target key end

     0   :  { %v3355_v1 = vmov 0   ;;  %vm125_vm0 = vcmask 130048   ;;  %v3357_v18 = vmov 0.0   ;;  %vm2486_vm1 = vmmov 0   ;;  %s3348_s1 = inlined_call_operand.vmem [shape: bf16[16,384], index: 1, kind: input, shape index: {}]   ;;  %s3349_s0 = inlined_call_operand.vmem [shape: bf16[8,16,16], index: 0, kind: input, shape index: {}]   ;;  %s3350_s3 = inlined_call_operand.vmem [shape: bf16[128,384], index: 3, kind: input, shape index: {}]   ;;  %s3351_s5 = inlined_call_operand.vmem [shape: f32[1,16,128], index: 5, kind: input, shape index: {}]   ;;  %s3352_s2 = inlined_call_operand.vmem [shape: f32[1,384], index: 2, kind: input, shape index: {}]   ;;  %s3353_s4 = inlined_call_operand.vmem [shape: f32[1,128], index: 4, kind: input, shape index: {}]   ;;  %s3354_s6 = inlined_call_operand.vmem [shape: bf16[8,16,128], index: 6, kind: output, shape index: {}]  }
   0x1   :  { %v2255_v0 = vld [vmem:[%s3348_s1 + $0x4] ss:$12 sps:$4 sm:$0xff]   ;;  %182 = vmatprep.mubr.bf16.mxu0 %v3355_v1  ;;  %242 = vmatprep.mubr.bf16.mxu1 %v3355_v1  ;;  %v2257_v2 = vld [vmem:[%s3348_s1] ss:$12 sps:$4 sm:$0xff]   ;;  %v2546_v6 = vld [vmem:[%s3350_s3 + $0x1c] ss:$12 sps:$4 sm:$0xff]   ;;  %v54_v43 = vlaneseq }
   0x2   :  { %150 = vmatprep.subr.bf16.mxu0 %v2255_v0  ;;  %v2258_v3 = vld [vmem:[%s3349_s0] sm:$0xff]   ;;  %2186 = vmatprep.subr.bf16.mxu1 %v2255_v0  ;;  %v2265_v9 = vld [vmem:[%s3349_s0 + $0x8] sm:$0xff]   ;;  %v2569_v10 = vld [vmem:[%s3350_s3 + $0x30] ss:$12 sps:$4 sm:$0xff]  }
   0x3   :  { %151 = vmatpush1.bf16.msra.mxu0 %v2257_v2  ;;  %v2536_v4 = vld [vmem:[%s3350_s3 + $0x4] ss:$12 sps:$4 sm:$0xff]   ;;  %v2541_v5 = vld [vmem:[%s3350_s3] ss:$12 sps:$4 sm:$0xff]   ;;  %2187 = vmatpush1.bf16.msra.mxu1 %v2257_v2  ;;  %v2278_v13 = vld [vmem:[%s3348_s1 + $0x8] ss:$12 sps:$4 sm:$0xff]  }
   0x4   :  { %584 = vmatprep.subr.bf16.mxu0 %v2536_v4  ;;  %v2555_v7 = vld [vmem:[%s3350_s3 + $0x18] ss:$12 sps:$4 sm:$0xff]   ;;  %v2561_v8 = vld [vmem:[%s3350_s3 + $0x34] ss:$12 sps:$4 sm:$0xff]   ;;  %2008 = vmatprep.subr.bf16.mxu1 %v2278_v13  ;;  %v2622_v20 = vld [vmem:[%s3350_s3 + $0x7c] ss:$12 sps:$4 sm:$0xff]  }
   0x5   :  { %v2575_v11 = vld [vmem:[%s3349_s0 + $0x30] sm:$0xff]   ;;  %v2581_v12 = vld [vmem:[%s3350_s3 + $0x4c] ss:$12 sps:$4 sm:$0xff]   ;;  %v2282_v29 = vld [vmem:[%s3349_s0 + $0x20] sm:$0xff]   ;;  %v55_v45 = vshrl.u32 %v54_v43, 7 }
   0x6   :  { %1761 = vmatmul.mubr.msk.bf16.vlgmr.msra.gmra.mrb[0].mxu0 %vm125_vm0, %v2258_v3  ;;  %1767 = vmatmul.mubr.msk.bf16.vlgmr.msra.gmra.mrb[0].mxu1 %vm125_vm0, %v2575_v11  ;;  %v2595_v14 = vld [vmem:[%s3350_s3 + $0x48] ss:$12 sps:$4 sm:$0xff]   ;;  %v2601_v15 = vld [vmem:[%s3350_s3 + $0x64] ss:$12 sps:$4 sm:$0xff]   ;;  %v2606_v16 = vld [vmem:[%s3349_s0 + $0x38] sm:$0xff]  }
   0x7   :  { %585 = vmatpush1.bf16.msra.mxu0 %v2541_v5  ;;  %192 = vmatprep.mubr.bf16.mxu0 %v3355_v1  ;;  %v2269_v17 = vld [vmem:[%s3349_s0 + $0x10] sm:$0xff]   ;;  %v2616_v19 = vld [vmem:[%s3350_s3 + $0x60] ss:$12 sps:$4 sm:$0xff]   ;;  %v2633_v21 = vld [vmem:[%s3350_s3 + $0x78] ss:$12 sps:$4 sm:$0xff]   ;;  %v64_v48 = vsub.s32 2, %v55_v45 }
   0x8   :  { %586 = vmatprep.subr.bf16.mxu0 %v2546_v6  ;;  %252 = vmatprep.mubr.bf16.mxu1 %v3355_v1  ;;  %v2639_v22 = vld [vmem:[%s3350_s3 + $0x94] ss:$12 sps:$4 sm:$0xff]   ;;  %v2273_v23 = vld [vmem:[%s3349_s0 + $0x18] sm:$0xff]   ;;  %v2287_v32 = vld [vmem:[%s3349_s0 + $0x28] sm:$0xff]   ;;  %v60_v43 = vsub.s32 1, %v55_v45 }
   0x9   :  { %2009 = vmatpush3.bf16.msra.mxu1 %v2278_v13  ;;  %v2647_v24 = vld [vmem:[%s3350_s3 + $0x8] ss:$12 sps:$4 sm:$0xff]   ;;  %v2653_v25 = vld [vmem:[%s3350_s3 + $0x90] ss:$12 sps:$4 sm:$0xff]   ;;  %v2659_v26 = vld [vmem:[%s3350_s3 + $0xac] ss:$12 sps:$4 sm:$0xff]  }
   0xa   :  { %2026 = vmatprep.subr.bf16.mxu1 %v3357_v18  ;;  %v2667_v27 = vld [vmem:[%s3350_s3 + $0x20] ss:$12 sps:$4 sm:$0xff]   ;;  %v2674_v28 = vld [vmem:[%s3350_s3 + $0xa8] ss:$12 sps:$4 sm:$0xff]   ;;  %v2686_v30 = vld [vmem:[%s3350_s3 + $0x38] ss:$12 sps:$4 sm:$0xff]  }
   0xb   :  { %587 = vmatpush1.bf16.msra.mxu0 %v2555_v7  ;;  %v2697_v31 = vld [vmem:[%s3350_s3 + $0x50] ss:$12 sps:$4 sm:$0xff]   ;;  %v2709_v33 = vld [vmem:[%s3350_s3 + $0x68] ss:$12 sps:$4 sm:$0xff]   ;;  %v2718_v34 = vld [vmem:[%s3350_s3 + $0x80] ss:$12 sps:$4 sm:$0xff]  }
   0xc   :  { %588 = vmatprep.subr.bf16.mxu0 %v2561_v8  ;;  %v2724_v35 = vld [vmem:[%s3351_s5] sm:$0xff]  ;;  %v2729_v36 = vld [vmem:[%s3351_s5 + $0x8] sm:$0xff]  ;;  %v2749_v39 = vld [vmem:[%s3350_s3 + $0xb0] ss:$12 sps:$4 sm:$0xff]  }
   0xd   :  { %v455_v37 = vpack.c.bf16 %v2729_v36, %v2724_v35  ;;  %v2740_v38 = vld [vmem:[%s3350_s3 + $0x98] ss:$12 sps:$4 sm:$0xff]   ;;  %v52_v51 = vld [vmem:[%s3352_s2] sm:$0x7] }
   0xe   :  { %1762 = vmatmul.mubr.msk.bf16.gmra.mrb[4].mxu0 %vm125_vm0, %v2265_v9  ;;  %1768 = vmatmul.mubr.msk.bf16.gmra.mrb[4].mxu1 %vm125_vm0, %v2606_v16  ;;  %v2810_v52 = vrot.slane %v52_v51, %v64_v48 }
   0xf   :  { %589 = vmatpush1.bf16.msra.mxu0 %v2569_v10  ;;  %202 = vmatprep.mubr.bf16.mxu0 %v3355_v1 }
  0x10   :  { %590 = vmatprep.subr.bf16.mxu0 %v2581_v12  ;;  %2010 = vmatprep.mubr.msk.bf16.mxu1 %vm125_vm0, %v2258_v3 }
  0x13   :  { %591 = vmatpush1.bf16.msra.mxu0 %v2595_v14 }
  0x14   :  { %592 = vmatprep.subr.bf16.mxu0 %v2601_v15 }
  0x16   :  { %1763 = vmatmul.mubr.msk.bf16.gmra.mrb[8].mxu0 %vm125_vm0, %v2269_v17  ;;  %2011 = vmatmul.mubr.msk.bf16.vlgmr.msra.gmra.mrb[8].mxu1 %vm125_vm0, %v2265_v9 }
  0x17   :  { %212 = vmatprep.mubr.bf16.mxu0 %v3355_v1  ;;  %593 = vmatpush1.bf16.msra.mxu0 %v2616_v19 }
  0x18   :  { %594 = vmatprep.subr.bf16.mxu0 %v2622_v20  ;;  %2027 = vmatpush3.bf16.msra.mxu1 %v2647_v24 }
  0x19   :  { %2028 = vmatprep.subr.bf16.mxu1 %v3357_v18  ;;  %2014 = vmatprep.mubr.msk.bf16.mxu1 %vm125_vm0, %v2269_v17 }
  0x1b   :  { %595 = vmatpush1.bf16.msra.mxu0 %v2633_v21 }
  0x1c   :  { %596 = vmatprep.subr.bf16.mxu0 %v2639_v22  ;;  %2029 = vmatpush3.bf16.msra.mxu1 %v2667_v27 }
  0x1d   :  { %2030 = vmatprep.subr.bf16.mxu1 %v3357_v18 }
  0x1e   :  { %1764 = vmatmul.mubr.msk.bf16.gmra.mrb[12].mxu0 %vm125_vm0, %v2273_v23  ;;  %2015 = vmatmul.mubr.msk.bf16.gmra.mrb[12].mxu1 %vm125_vm0, %v2273_v23 }
  0x1f   :  { %222 = vmatprep.mubr.bf16.mxu0 %v3355_v1  ;;  %597 = vmatpush1.bf16.msra.mxu0 %v2653_v25 }
  0x20   :  { %598 = vmatprep.subr.bf16.mxu0 %v2659_v26  ;;  %2031 = vmatpush3.bf16.msra.mxu1 %v2686_v30 }
  0x21   :  { %2032 = vmatprep.subr.bf16.mxu1 %v3357_v18  ;;  %2018 = vmatprep.mubr.msk.bf16.mxu1 %vm125_vm0, %v2282_v29 }
  0x23   :  { %599 = vmatpush1.bf16.msra.mxu0 %v2674_v28 }
  0x24   :  { %729 = vmatprep.subr.bf16.mxu0 %v2536_v4  ;;  %2033 = vmatpush3.bf16.msra.mxu1 %v2697_v31 }
  0x25   :  { %2034 = vmatprep.subr.bf16.mxu1 %v3357_v18 }
  0x26   :  { %1765 = vmatmul.mubr.msk.bf16.gmra.mrb[16].mxu0 %vm125_vm0, %v2282_v29  ;;  %2019 = vmatmul.mubr.msk.bf16.gmra.mrb[16].mxu1 %vm125_vm0, %v2287_v32 }
  0x27   :  { %232 = vmatprep.mubr.bf16.mxu0 %v3355_v1  ;;  %2022 = vmatprep.mubr.msk.bf16.mxu1 %vm125_vm0, %v2575_v11 }
  0x28   :  { %2035 = vmatpush3.bf16.msra.mxu1 %v2709_v33 }
  0x29   :  { %2036 = vmatprep.subr.bf16.mxu1 %v3357_v18 }
  0x2c   :  { %2037 = vmatpush3.bf16.msra.mxu1 %v2718_v34 }
  0x2d   :  { %2038 = vmatprep.subr.bf16.mxu1 %v3357_v18 }
  0x2e   :  { %1766 = vmatmul.mubr.msk.bf16.gmra.mrb[20].mxu0 %vm125_vm0, %v2287_v32  ;;  %2023 = vmatmul.mubr.msk.bf16.gmra.mrb[20].mxu1 %vm125_vm0, %v2606_v16  ;;  %v56_v32 = vsub.s32 0, %v55_v45 }
  0x2f   :  { %616 = vmatprep.mubr.bf16.mxu0 %v3355_v1  ;;  %2042 = vmatprep.mubr.msk.bf16.mxu1 %vm2486_vm1, %v3357_v18 }
  0x30   :  { %2039 = vmatpush3.bf16.msra.mxu1 %v2740_v38  ;;  %v2846_v48 = vrot.slane %v52_v51, %v56_v32 }
  0x31   :  { %2040 = vmatprep.subr.bf16.mxu1 %v3357_v18 }
  0x34   :  { %2041 = vmatpush3.bf16.msra.mxu1 %v2749_v39 }
  0x35   :  { %2046 = vmatprep.subr.bf16.mxu1 %v3357_v18 }
  0x36   :  { %617 = vmatmul.mubr.bf16.vlgmr.msra.gmra.mrb[0].mxu0 %v455_v37 }
  0x37   :  { %730 = vmatpush1.bf16.msra.mxu0 %v2541_v5  ;;  %761 = vmatprep.mubr.bf16.mxu0 %v3355_v1 }
  0x38   :  { %731 = vmatprep.subr.bf16.mxu0 %v2546_v6  ;;  %2043 = vmatmul.mubr.bf16.vlgmr.msra.gmra.mrb[24].mxu1 %v455_v37 }
  0x39   :  { %2047 = vmatpush3.bf16.msra.mxu1 %v2647_v24  ;;  %2062 = vmatprep.mubr.msk.bf16.mxu1 %vm2486_vm1, %v3357_v18 }
  0x3a   :  { %2048 = vmatprep.subr.bf16.mxu1 %v3357_v18 }
  0x3b   :  { %732 = vmatpush1.bf16.msra.mxu0 %v2555_v7 }
  0x3c   :  { %733 = vmatprep.subr.bf16.mxu0 %v2561_v8 }
  0x3d   :  { %2049 = vmatpush3.bf16.msra.mxu1 %v2667_v27 }
  0x3e   :  { %2050 = vmatprep.subr.bf16.mxu1 %v3357_v18 }
  0x3f   :  { %734 = vmatpush1.bf16.msra.mxu0 %v2569_v10 }
  0x40   :  { %735 = vmatprep.subr.bf16.mxu0 %v2581_v12 }
  0x41   :  { %2051 = vmatpush3.bf16.msra.mxu1 %v2686_v30 }
  0x42   :  { %2052 = vmatprep.subr.bf16.mxu1 %v3357_v18 }
  0x43   :  { %736 = vmatpush1.bf16.msra.mxu0 %v2595_v14 }
  0x44   :  { %737 = vmatprep.subr.bf16.mxu0 %v2601_v15 }
  0x45   :  { %2053 = vmatpush3.bf16.msra.mxu1 %v2697_v31 }
  0x46   :  { %2054 = vmatprep.subr.bf16.mxu1 %v3357_v18 }
  0x47   :  { %738 = vmatpush1.bf16.msra.mxu0 %v2616_v19 }
  0x48   :  { %739 = vmatprep.subr.bf16.mxu0 %v2622_v20 }
  0x49   :  { %2055 = vmatpush3.bf16.msra.mxu1 %v2709_v33 }
  0x4a   :  { %2056 = vmatprep.subr.bf16.mxu1 %v3357_v18 }
  0x4b   :  { %740 = vmatpush1.bf16.msra.mxu0 %v2633_v21 }
  0x4c   :  { %741 = vmatprep.subr.bf16.mxu0 %v2639_v22 }
  0x4d   :  { %2057 = vmatpush3.bf16.msra.mxu1 %v2718_v34 }
  0x4e   :  { %2058 = vmatprep.subr.bf16.mxu1 %v3357_v18 }
  0x4f   :  { %742 = vmatpush1.bf16.msra.mxu0 %v2653_v25 }
  0x50   :  { %743 = vmatprep.subr.bf16.mxu0 %v2659_v26 }
  0x51   :  { %2059 = vmatpush3.bf16.msra.mxu1 %v2740_v38 }
  0x52   :  { %2060 = vmatprep.subr.bf16.mxu1 %v3357_v18 }
  0x53   :  { %744 = vmatpush1.bf16.msra.mxu0 %v2674_v28 }
  0x54   :  { %875 = vmatprep.subr.bf16.mxu0 %v2536_v4 }
  0x55   :  { %2061 = vmatpush3.bf16.msra.mxu1 %v2749_v39 }
  0x56   :  { %2066 = vmatprep.subr.bf16.mxu1 %v3357_v18 }
  0xd9   :  { %v2791_v40 = vpop.f32.mrb[0].mxu1 }
  0xda   :  { %v2793_v41 = vpop.f32.mrb[1].mxu1 }
  0xdb   :  { %v2795_v42 = vpop.f32.mrb[2].mxu1 }
  0xdc   :  { %v2797_v44 = vpop.f32.mrb[3].mxu1 }
  0xdd   :  { %3359 = vst [vmem:[#allocation4_spill] sm:$0xff] %v2797_v44 }
  0xe1   :  { %v2799_v46 = vpop.f32.mrb[4].mxu1 }
  0xe2   :  { %3360 = vst [vmem:[#allocation5_spill] sm:$0xff] %v2799_v46  ;;  %v2801_v47 = vpop.f32.mrb[5].mxu1 }
  0xe3   :  { %3361 = vst [vmem:[#allocation6_spill] sm:$0xff] %v2801_v47  ;;  %v2803_v49 = vpop.f32.mrb[6].mxu1 }
  0xe4   :  { %3362 = vst [vmem:[#allocation7_spill] sm:$0xff] %v2803_v49  ;;  %v2805_v50 = vpop.f32.mrb[7].mxu1 }
  0xe5   :  { %3363 = vst [vmem:[#allocation8_spill] sm:$0xff] %v2805_v50 }
  0xe9   :  { %v2012_v53 = vpop.f32.mrb[8].mxu1 }
  0xea   :  { %v2813_v54 = vadd.f32 %v2012_v53, %v2810_v52  ;;  %v2815_v55 = vpop.f32.mrb[9].mxu1 }
  0xeb   :  { %v2013_v56 = vpop.f32.mrb[10].mxu1 }
  0xec   :  { %v2818_v57 = vadd.f32 %v2013_v56, %v2810_v52  ;;  %v2820_v58 = vpop.f32.mrb[11].mxu1 }
  0xf1   :  { %v2016_v59 = vpop.f32.mrb[12].mxu1 }
  0xf2   :  { %v2823_v60 = vadd.f32 %v2016_v59, %v2810_v52  ;;  %v313_v61 = vpop.f32.mrb[13].mxu1 }
  0xf3   :  { %v2826_v62 = vadd.f32 %v313_v61, %v2810_v52  ;;  %v2017_v63 = vpop.f32.mrb[14].mxu1 }
  0xf4   :  { %v2829_v0 = vadd.f32 %v2017_v63, %v2810_v52  ;;  %v316_v2 = vpop.f32.mrb[15].mxu1 }
  0xf5   :  { %v2832_v3 = vadd.f32 %v316_v2, %v2810_v52 }
  0xf9   :  { %v2020_v9 = vpop.f32.mrb[16].mxu1 }
  0xfa   :  { %v2835_v11 = vadd.f32 %v2020_v9, %v2810_v52  ;;  %v329_v13 = vpop.f32.mrb[17].mxu1 }
  0xfb   :  { %v2838_v16 = vadd.f32 %v329_v13, %v2810_v52  ;;  %v2021_v17 = vpop.f32.mrb[18].mxu1 }
  0xfc   :  { %v2841_v23 = vadd.f32 %v2021_v17, %v2810_v52  ;;  %v332_v29 = vpop.f32.mrb[19].mxu1  ;;  %v2855_v17 = vrot.slane %v52_v51, %v60_v43 }
  0xfd   :  { %v2844_v37 = vadd.f32 %v332_v29, %v2810_v52 }
 0x101   :  { %v2024_v53 = vpop.f32.mrb[20].mxu1 }
 0x102   :  { %v2849_v59 = vadd.f32 %v2024_v53, %v2810_v52  ;;  %v345_v61 = vpop.f32.mrb[21].mxu1 }
 0x103   :  { %v2853_v9 = vadd.f32 %v345_v61, %v2810_v52  ;;  %v2025_v13 = vpop.f32.mrb[22].mxu1 }
 0x104   :  { %3364 = vst [vmem:[#allocation9_spill] sm:$0xff] %v2849_v59  ;;  %v2858_v45 = vadd.f32 %v2025_v13, %v2810_v52  ;;  %v348_v32 = vpop.f32.mrb[23].mxu1 }
 0x105   :  { %3365 = vst [vmem:[#allocation10_spill] sm:$0xff] %v2853_v9  ;;  %v2862_v59 = vadd.f32 %v348_v32, %v2810_v52 }
 0x106   :  { %3366 = vst [vmem:[#allocation11_spill] sm:$0xff] %v2858_v45 }
 0x107   :  { %3367 = vst [vmem:[#allocation12_spill] sm:$0xff] %v2862_v59 }
 0x109   :  { %v618_v56 = vpop.f32.mrb[0].mxu0 }
 0x10a   :  { %v2188_v63 = vadd.f32 %v618_v56, %v2846_v48  ;;  %v620_v2 = vpop.f32.mrb[1].mxu0 }
 0x10b   :  { %v622_v29 = vpop.f32.mrb[2].mxu0  ;;  %v2189_v56 = vadd.f32 %v620_v2, %v2855_v17  ;;  %v661_v51 = vpop.f32.mrb[24].mxu1 }
 0x10c   :  { %v1802_v1 = vmul.f32 -1.442695, %v2188_v63  ;;  %v2190_v18 = vadd.f32 %v622_v29, %v2846_v48  ;;  %v624_v53 = vpop.f32.mrb[3].mxu0  ;;  %v2044_v49 = vpop.f32.mrb[25].mxu1 }
 0x10d   :  { %v2191_v50 = vadd.f32 %v624_v53, %v2855_v17  ;;  %v1804_v43 = vmul.f32 -1.442695, %v2189_v56  ;;  %v664_v13 = vpop.f32.mrb[26].mxu1 }
 0x10e   :  { %2299 = vpow2.f32 %v1802_v1  ;;  %v1803_v61 = vmul.f32 -1.442695, %v2190_v18  ;;  %v2045_v47 = vpop.f32.mrb[27].mxu1  ;;  %v2869_v1 = vld [vmem:[%s3353_s4] ss:$0 sm:$0xff] }
 0x10f   :  { %v1805_v45 = vmul.f32 -1.442695, %v2191_v50  ;;  %v696_v49 = vadd.f32 %v2869_v1, %v661_v51 }
 0x110   :  { %2301 = vpow2.f32 %v1803_v61 }
 0x111   :  { %2303 = vpow2.f32 %v1804_v43  ;;  %v301_v43 = vadd.f32 %v2820_v58, %v2810_v52 }
 0x112   :  { %2305 = vpow2.f32 %v1805_v45  ;;  %v298_v45 = vadd.f32 %v2815_v55, %v2810_v52 }
 0x118   :  { %v2300_v63 = vpop.eup %2299 }
 0x119   :  { %v676_v29 = vadd.f32 1.0, %v2300_v63 }
 0x11a   :  { %v2302_v46 = vpop.eup %2301 }
 0x11b   :  { %2307 = vrcp.f32 %v676_v29  ;;  %v677_v32 = vadd.f32 1.0, %v2302_v46  ;;  %v2304_v2 = vpop.eup %2303  ;;  %v697_v46 = vadd.f32 %v2869_v1, %v664_v13 }
 0x11c   :  { %v2306_v18 = vpop.eup %2305  ;;  %v690_v53 = vadd.f32 1.0, %v2304_v2 }
 0x11d   :  { %2309 = vrcp.f32 %v677_v32  ;;  %v691_v50 = vadd.f32 1.0, %v2306_v18 }
 0x11e   :  { %2311 = vrcp.f32 %v690_v53 }
 0x11f   :  { %2313 = vrcp.f32 %v691_v50 }
 0x125   :  { %v2308_v47 = vpop.eup %2307 }
 0x126   :  { %v698_v56 = vmul.f32 %v2308_v47, %v696_v49 }
 0x127   :  { %v2310_v61 = vpop.eup %2309 }
 0x128   :  { %v700_v63 = vadd.f32 %v698_v56, %v298_v45  ;;  %v699_v29 = vmul.f32 %v2310_v61, %v697_v46  ;;  %v2312_v51 = vpop.eup %2311 }
 0x129   :  { %v2314_v2 = vpop.eup %2313  ;;  %v704_v18 = vsub.f32 1.0, %v2312_v51  ;;  %v708_v53 = vmul.f32 %v2312_v51, %v2724_v35  ;;  %v3368_v35 = vmov 0.0  }
 0x12a   :  { %2315 = vtanh.f32 %v700_v63  ;;  %v701_v32 = vadd.f32 %v699_v29, %v301_v43  ;;  %v705_v9 = vsub.f32 1.0, %v2314_v2  ;;  %v709_v47 = vmul.f32 %v2314_v2, %v2729_v36 }
 0x12b   :  { %v3369_v36 = vmov 0  }
 0x12c   :  { %2317 = vtanh.f32 %v701_v32 }
 0x134   :  { %v2316_v59 = vpop.eup %2315 }
 0x135   :  { %v706_v55 = vmul.f32 %v2316_v59, %v704_v18 }
 0x136   :  { %v2318_v49 = vpop.eup %2317 }
 0x137   :  { %v707_v13 = vmul.f32 %v2318_v49, %v705_v9  ;;  %v2879_v44 = vadd.f32 %v708_v53, %v706_v55 }
 0x139   :  { %v2881_v52 = vadd.f32 %v709_v47, %v707_v13 }
 0x13b   :  { %v712_v58 = vpack.c.bf16 %v2881_v52, %v2879_v44 }
 0x13d   :  { %1884 = vst [vmem:[%s3354_s6] sm:$0xff] %v712_v58   ;;  %762 = vmatmul.mubr.bf16.vlgmr.msra.gmra.mrb[4].mxu0 %v712_v58  ;;  %2063 = vmatmul.mubr.bf16.vlgmr.msra.gmra.mrb[28].mxu1 %v712_v58 }
 0x13e   :  { %876 = vmatpush1.bf16.msra.mxu0 %v2541_v5  ;;  %2067 = vmatpush3.bf16.msra.mxu1 %v2647_v24 }
 0x13f   :  { %877 = vmatprep.subr.bf16.mxu0 %v2546_v6  ;;  %2068 = vmatprep.subr.bf16.mxu1 %v3368_v35 }
 0x140   :  { %907 = vmatprep.mubr.bf16.mxu0 %v3369_v36  ;;  %2082 = vmatprep.mubr.msk.bf16.mxu1 %vm2486_vm1, %v3368_v35 }
 0x142   :  { %878 = vmatpush1.bf16.msra.mxu0 %v2555_v7  ;;  %2069 = vmatpush3.bf16.msra.mxu1 %v2667_v27 }
 0x143   :  { %879 = vmatprep.subr.bf16.mxu0 %v2561_v8  ;;  %2070 = vmatprep.subr.bf16.mxu1 %v3368_v35 }
 0x146   :  { %880 = vmatpush1.bf16.msra.mxu0 %v2569_v10  ;;  %2071 = vmatpush3.bf16.msra.mxu1 %v2686_v30 }
 0x147   :  { %881 = vmatprep.subr.bf16.mxu0 %v2581_v12  ;;  %2072 = vmatprep.subr.bf16.mxu1 %v3368_v35 }
 0x14a   :  { %882 = vmatpush1.bf16.msra.mxu0 %v2595_v14  ;;  %2073 = vmatpush3.bf16.msra.mxu1 %v2697_v31 }
 0x14b   :  { %883 = vmatprep.subr.bf16.mxu0 %v2601_v15  ;;  %2074 = vmatprep.subr.bf16.mxu1 %v3368_v35 }
 0x14e   :  { %884 = vmatpush1.bf16.msra.mxu0 %v2616_v19  ;;  %2075 = vmatpush3.bf16.msra.mxu1 %v2709_v33 }
 0x14f   :  { %885 = vmatprep.subr.bf16.mxu0 %v2622_v20  ;;  %2076 = vmatprep.subr.bf16.mxu1 %v3368_v35 }
 0x152   :  { %886 = vmatpush1.bf16.msra.mxu0 %v2633_v21  ;;  %2077 = vmatpush3.bf16.msra.mxu1 %v2718_v34 }
 0x153   :  { %887 = vmatprep.subr.bf16.mxu0 %v2639_v22  ;;  %2078 = vmatprep.subr.bf16.mxu1 %v3368_v35 }
 0x156   :  { %888 = vmatpush1.bf16.msra.mxu0 %v2653_v25  ;;  %2079 = vmatpush3.bf16.msra.mxu1 %v2740_v38 }
 0x157   :  { %889 = vmatprep.subr.bf16.mxu0 %v2659_v26  ;;  %2080 = vmatprep.subr.bf16.mxu1 %v3368_v35 }
 0x15a   :  { %890 = vmatpush1.bf16.msra.mxu0 %v2674_v28  ;;  %2081 = vmatpush3.bf16.msra.mxu1 %v2749_v39 }
 0x15b   :  { %1021 = vmatprep.subr.bf16.mxu0 %v2536_v4  ;;  %2086 = vmatprep.subr.bf16.mxu1 %v3368_v35 }
 0x210   :  { %v763_v59 = vpop.f32.mrb[4].mxu0  ;;  %v806_v9 = vpop.f32.mrb[28].mxu1 }
 0x211   :  { %v2192_v50 = vadd.f32 %v763_v59, %v2846_v48  ;;  %v765_v45 = vpop.f32.mrb[5].mxu0  ;;  %v2064_v56 = vpop.f32.mrb[29].mxu1 }
 0x212   :  { %v767_v46 = vpop.f32.mrb[6].mxu0  ;;  %v809_v61 = vpop.f32.mrb[30].mxu1  ;;  %v2193_v51 = vadd.f32 %v765_v45, %v2855_v17  ;;  %v841_v45 = vadd.f32 %v2869_v1, %v806_v9 }
 0x213   :  { %v1808_v43 = vmul.f32 -1.442695, %v2192_v50  ;;  %v2194_v63 = vadd.f32 %v767_v46, %v2846_v48  ;;  %v769_v29 = vpop.f32.mrb[7].mxu0  ;;  %v2065_v32 = vpop.f32.mrb[31].mxu1 }
 0x214   :  { %v2195_v18 = vadd.f32 %v769_v29, %v2855_v17  ;;  %v1810_v55 = vmul.f32 -1.442695, %v2193_v51  ;;  %v842_v29 = vadd.f32 %v2869_v1, %v809_v61 }
 0x215   :  { %2319 = vpow2.f32 %v1808_v43  ;;  %v1809_v2 = vmul.f32 -1.442695, %v2194_v63 }
 0x216   :  { %v1811_v53 = vmul.f32 -1.442695, %v2195_v18 }
 0x217   :  { %2321 = vpow2.f32 %v1809_v2 }
 0x218   :  { %2323 = vpow2.f32 %v1810_v55 }
 0x219   :  { %2325 = vpow2.f32 %v1811_v53 }
 0x21f   :  { %v2320_v49 = vpop.eup %2319 }
 0x220   :  { %v821_v13 = vadd.f32 1.0, %v2320_v49 }
 0x221   :  { %v2322_v47 = vpop.eup %2321 }
 0x222   :  { %2327 = vrcp.f32 %v821_v13  ;;  %v822_v58 = vadd.f32 1.0, %v2322_v47  ;;  %v2324_v59 = vpop.eup %2323 }
 0x223   :  { %v2326_v50 = vpop.eup %2325  ;;  %v835_v56 = vadd.f32 1.0, %v2324_v59 }
 0x224   :  { %2329 = vrcp.f32 %v822_v58  ;;  %v836_v46 = vadd.f32 1.0, %v2326_v50 }
 0x225   :  { %2331 = vrcp.f32 %v835_v56 }
 0x226   :  { %2333 = vrcp.f32 %v836_v46 }
 0x22c   :  { %v2328_v43 = vpop.eup %2327 }
 0x22d   :  { %v843_v63 = vmul.f32 %v2328_v43, %v841_v45 }
 0x22e   :  { %v2330_v32 = vpop.eup %2329 }
 0x22f   :  { %v845_v51 = vadd.f32 %v843_v63, %v2813_v54  ;;  %v844_v2 = vmul.f32 %v2330_v32, %v842_v29  ;;  %v2332_v55 = vpop.eup %2331 }
 0x230   :  { %v2334_v53 = vpop.eup %2333  ;;  %v849_v49 = vsub.f32 1.0, %v2332_v55  ;;  %v853_v58 = vmul.f32 %v2332_v55, %v2879_v44 }
 0x231   :  { %2335 = vtanh.f32 %v845_v51  ;;  %v846_v18 = vadd.f32 %v844_v2, %v2818_v57  ;;  %v850_v9 = vsub.f32 1.0, %v2334_v53  ;;  %v854_v61 = vmul.f32 %v2334_v53, %v2881_v52 }
 0x233   :  { %2337 = vtanh.f32 %v846_v18 }
 0x23b   :  { %v2336_v13 = vpop.eup %2335 }
 0x23c   :  { %v851_v47 = vmul.f32 %v2336_v13, %v849_v49 }
 0x23d   :  { %v2338_v59 = vpop.eup %2337 }
 0x23e   :  { %v852_v50 = vmul.f32 %v2338_v59, %v850_v9  ;;  %v2933_v56 = vadd.f32 %v853_v58, %v851_v47 }
 0x240   :  { %v2935_v54 = vadd.f32 %v854_v61, %v852_v50 }
 0x242   :  { %v857_v57 = vpack.c.bf16 %v2935_v54, %v2933_v56 }
 0x244   :  { %1920 = vst [vmem:[%s3354_s6 + $0x8] sm:$0xff] %v857_v57   ;;  %908 = vmatmul.mubr.bf16.vlgmr.msra.gmra.mrb[8].mxu0 %v857_v57  ;;  %2083 = vmatmul.mubr.bf16.vlgmr.msra.gmra.mrb[32].mxu1 %v857_v57 }
 0x245   :  { %1022 = vmatpush1.bf16.msra.mxu0 %v2541_v5  ;;  %2087 = vmatpush3.bf16.msra.mxu1 %v2647_v24 }
 0x246   :  { %1023 = vmatprep.subr.bf16.mxu0 %v2546_v6  ;;  %2088 = vmatprep.subr.bf16.mxu1 %v3368_v35 }
 0x247   :  { %1053 = vmatprep.mubr.bf16.mxu0 %v3369_v36  ;;  %2102 = vmatprep.mubr.msk.bf16.mxu1 %vm2486_vm1, %v3368_v35 }
 0x249   :  { %1024 = vmatpush1.bf16.msra.mxu0 %v2555_v7  ;;  %2089 = vmatpush3.bf16.msra.mxu1 %v2667_v27 }
 0x24a   :  { %1025 = vmatprep.subr.bf16.mxu0 %v2561_v8  ;;  %2090 = vmatprep.subr.bf16.mxu1 %v3368_v35 }
 0x24d   :  { %1026 = vmatpush1.bf16.msra.mxu0 %v2569_v10  ;;  %2091 = vmatpush3.bf16.msra.mxu1 %v2686_v30 }
 0x24e   :  { %1027 = vmatprep.subr.bf16.mxu0 %v2581_v12  ;;  %2092 = vmatprep.subr.bf16.mxu1 %v3368_v35 }
 0x251   :  { %1028 = vmatpush1.bf16.msra.mxu0 %v2595_v14  ;;  %2093 = vmatpush3.bf16.msra.mxu1 %v2697_v31 }
 0x252   :  { %1029 = vmatprep.subr.bf16.mxu0 %v2601_v15  ;;  %2094 = vmatprep.subr.bf16.mxu1 %v3368_v35 }
 0x255   :  { %1030 = vmatpush1.bf16.msra.mxu0 %v2616_v19  ;;  %2095 = vmatpush3.bf16.msra.mxu1 %v2709_v33 }
 0x256   :  { %1031 = vmatprep.subr.bf16.mxu0 %v2622_v20  ;;  %2096 = vmatprep.subr.bf16.mxu1 %v3368_v35 }
 0x259   :  { %1032 = vmatpush1.bf16.msra.mxu0 %v2633_v21  ;;  %2097 = vmatpush3.bf16.msra.mxu1 %v2718_v34 }
 0x25a   :  { %1033 = vmatprep.subr.bf16.mxu0 %v2639_v22  ;;  %2098 = vmatprep.subr.bf16.mxu1 %v3368_v35 }
 0x25d   :  { %1034 = vmatpush1.bf16.msra.mxu0 %v2653_v25  ;;  %2099 = vmatpush3.bf16.msra.mxu1 %v2740_v38 }
 0x25e   :  { %1035 = vmatprep.subr.bf16.mxu0 %v2659_v26  ;;  %2100 = vmatprep.subr.bf16.mxu1 %v3368_v35 }
 0x261   :  { %1036 = vmatpush1.bf16.msra.mxu0 %v2674_v28  ;;  %2101 = vmatpush3.bf16.msra.mxu1 %v2749_v39 }
 0x262   :  { %1167 = vmatprep.subr.bf16.mxu0 %v2536_v4  ;;  %2106 = vmatprep.subr.bf16.mxu1 %v3368_v35 }
 0x317   :  { %v909_v44 = vpop.f32.mrb[8].mxu0  ;;  %v952_v52 = vpop.f32.mrb[32].mxu1 }
 0x318   :  { %v2196_v45 = vadd.f32 %v909_v44, %v2846_v48  ;;  %v911_v46 = vpop.f32.mrb[9].mxu0  ;;  %v2084_v43 = vpop.f32.mrb[33].mxu1 }
 0x319   :  { %v913_v63 = vpop.f32.mrb[10].mxu0  ;;  %v955_v29 = vpop.f32.mrb[34].mxu1  ;;  %v2197_v55 = vadd.f32 %v911_v46, %v2855_v17 }
 0x31a   :  { %v1816_v32 = vmul.f32 -1.442695, %v2196_v45  ;;  %v2198_v51 = vadd.f32 %v913_v63, %v2846_v48  ;;  %v915_v2 = vpop.f32.mrb[11].mxu0  ;;  %v2085_v18 = vpop.f32.mrb[35].mxu1  ;;  %v987_v45 = vadd.f32 %v2869_v1, %v952_v52 }
 0x31b   :  { %v2199_v49 = vadd.f32 %v915_v2, %v2855_v17  ;;  %v1818_v13 = vmul.f32 -1.442695, %v2197_v55 }
 0x31c   :  { %2339 = vpow2.f32 %v1816_v32  ;;  %v1817_v53 = vmul.f32 -1.442695, %v2198_v51  ;;  %v988_v32 = vadd.f32 %v2869_v1, %v955_v29 }
 0x31d   :  { %v1819_v9 = vmul.f32 -1.442695, %v2199_v49 }
 0x31e   :  { %2341 = vpow2.f32 %v1817_v53 }
 0x31f   :  { %2343 = vpow2.f32 %v1818_v13 }
 0x320   :  { %2345 = vpow2.f32 %v1819_v9 }
 0x326   :  { %v2340_v47 = vpop.eup %2339 }
 0x327   :  { %v967_v58 = vadd.f32 1.0, %v2340_v47 }
 0x328   :  { %v2342_v59 = vpop.eup %2341 }
 0x329   :  { %2347 = vrcp.f32 %v967_v58  ;;  %v968_v50 = vadd.f32 1.0, %v2342_v59  ;;  %v2344_v61 = vpop.eup %2343 }
 0x32a   :  { %v2346_v57 = vpop.eup %2345  ;;  %v981_v44 = vadd.f32 1.0, %v2344_v61 }
 0x32b   :  { %2349 = vrcp.f32 %v968_v50  ;;  %v982_v46 = vadd.f32 1.0, %v2346_v57 }
 0x32c   :  { %2351 = vrcp.f32 %v981_v44 }
 0x32d   :  { %2353 = vrcp.f32 %v982_v46 }
 0x333   :  { %v2348_v43 = vpop.eup %2347 }
 0x334   :  { %v989_v63 = vmul.f32 %v2348_v43, %v987_v45 }
 0x335   :  { %v2350_v51 = vpop.eup %2349 }
 0x336   :  { %v991_v2 = vadd.f32 %v989_v63, %v2826_v62  ;;  %v990_v18 = vmul.f32 %v2350_v51, %v988_v32  ;;  %v2352_v53 = vpop.eup %2351 }
 0x337   :  { %v2354_v49 = vpop.eup %2353  ;;  %v995_v13 = vsub.f32 1.0, %v2352_v53  ;;  %v999_v58 = vmul.f32 %v2352_v53, %v2933_v56 }
 0x338   :  { %2355 = vtanh.f32 %v991_v2  ;;  %v992_v55 = vadd.f32 %v990_v18, %v2832_v3  ;;  %v996_v52 = vsub.f32 1.0, %v2354_v49  ;;  %v1000_v29 = vmul.f32 %v2354_v49, %v2935_v54 }
 0x33a   :  { %2357 = vtanh.f32 %v992_v55 }
 0x342   :  { %v2356_v9 = vpop.eup %2355 }
 0x343   :  { %v997_v47 = vmul.f32 %v2356_v9, %v995_v13 }
 0x344   :  { %v2358_v59 = vpop.eup %2357 }
 0x345   :  { %v998_v50 = vmul.f32 %v2358_v59, %v996_v52  ;;  %v2987_v61 = vadd.f32 %v999_v58, %v997_v47 }
 0x347   :  { %v2989_v62 = vadd.f32 %v1000_v29, %v998_v50 }
 0x349   :  { %v1003_v3 = vpack.c.bf16 %v2989_v62, %v2987_v61 }
 0x34b   :  { %1921 = vst [vmem:[%s3354_s6 + $0x10] sm:$0xff] %v1003_v3   ;;  %1054 = vmatmul.mubr.bf16.vlgmr.msra.gmra.mrb[12].mxu0 %v1003_v3  ;;  %2103 = vmatmul.mubr.bf16.vlgmr.msra.gmra.mrb[36].mxu1 %v1003_v3 }
 0x34c   :  { %1168 = vmatpush1.bf16.msra.mxu0 %v2541_v5  ;;  %2107 = vmatpush3.bf16.msra.mxu1 %v2647_v24 }
 0x34d   :  { %1169 = vmatprep.subr.bf16.mxu0 %v2546_v6  ;;  %2108 = vmatprep.subr.bf16.mxu1 %v3368_v35 }
 0x34e   :  { %1199 = vmatprep.mubr.bf16.mxu0 %v3369_v36  ;;  %2122 = vmatprep.mubr.msk.bf16.mxu1 %vm2486_vm1, %v3368_v35 }
 0x350   :  { %1170 = vmatpush1.bf16.msra.mxu0 %v2555_v7  ;;  %2109 = vmatpush3.bf16.msra.mxu1 %v2667_v27 }
 0x351   :  { %1171 = vmatprep.subr.bf16.mxu0 %v2561_v8  ;;  %2110 = vmatprep.subr.bf16.mxu1 %v3368_v35 }
 0x354   :  { %1172 = vmatpush1.bf16.msra.mxu0 %v2569_v10  ;;  %2111 = vmatpush3.bf16.msra.mxu1 %v2686_v30 }
 0x355   :  { %1173 = vmatprep.subr.bf16.mxu0 %v2581_v12  ;;  %2112 = vmatprep.subr.bf16.mxu1 %v3368_v35 }
 0x358   :  { %1174 = vmatpush1.bf16.msra.mxu0 %v2595_v14  ;;  %2113 = vmatpush3.bf16.msra.mxu1 %v2697_v31 }
 0x359   :  { %1175 = vmatprep.subr.bf16.mxu0 %v2601_v15  ;;  %2114 = vmatprep.subr.bf16.mxu1 %v3368_v35 }
 0x35c   :  { %1176 = vmatpush1.bf16.msra.mxu0 %v2616_v19  ;;  %2115 = vmatpush3.bf16.msra.mxu1 %v2709_v33 }
 0x35d   :  { %1177 = vmatprep.subr.bf16.mxu0 %v2622_v20  ;;  %2116 = vmatprep.subr.bf16.mxu1 %v3368_v35 }
 0x360   :  { %1178 = vmatpush1.bf16.msra.mxu0 %v2633_v21  ;;  %2117 = vmatpush3.bf16.msra.mxu1 %v2718_v34 }
 0x361   :  { %1179 = vmatprep.subr.bf16.mxu0 %v2639_v22  ;;  %2118 = vmatprep.subr.bf16.mxu1 %v3368_v35 }
 0x364   :  { %1180 = vmatpush1.bf16.msra.mxu0 %v2653_v25  ;;  %2119 = vmatpush3.bf16.msra.mxu1 %v2740_v38 }
 0x365   :  { %1181 = vmatprep.subr.bf16.mxu0 %v2659_v26  ;;  %2120 = vmatprep.subr.bf16.mxu1 %v3368_v35 }
 0x368   :  { %1182 = vmatpush1.bf16.msra.mxu0 %v2674_v28  ;;  %2121 = vmatpush3.bf16.msra.mxu1 %v2749_v39 }
 0x369   :  { %1313 = vmatprep.subr.bf16.mxu0 %v2536_v4  ;;  %2126 = vmatprep.subr.bf16.mxu1 %v3368_v35 }
 0x41e   :  { %v1055_v5 = vpop.f32.mrb[12].mxu0  ;;  %v1098_v6 = vpop.f32.mrb[36].mxu1 }
 0x41f   :  { %v2200_v7 = vadd.f32 %v1055_v5, %v2846_v48  ;;  %v1057_v8 = vpop.f32.mrb[13].mxu0  ;;  %v2104_v10 = vpop.f32.mrb[37].mxu1  ;;  %v1133_v2 = vadd.f32 %v2869_v1, %v1098_v6 }
 0x420   :  { %v1059_v12 = vpop.f32.mrb[14].mxu0  ;;  %v1101_v14 = vpop.f32.mrb[38].mxu1  ;;  %v2201_v22 = vadd.f32 %v1057_v8, %v2855_v17 }
 0x421   :  { %v1824_v15 = vmul.f32 -1.442695, %v2200_v7  ;;  %v2202_v19 = vadd.f32 %v1059_v12, %v2846_v48  ;;  %v1061_v20 = vpop.f32.mrb[15].mxu0  ;;  %v2105_v21 = vpop.f32.mrb[39].mxu1  ;;  %v1134_v49 = vadd.f32 %v2869_v1, %v1101_v14  ;;  %v3070_v14 = vld [vmem:[%s3350_s3 + $0x18] ss:$12 sps:$4 sm:$0xff]  }
 0x422   :  { %v2203_v4 = vadd.f32 %v1061_v20, %v2855_v17  ;;  %v1826_v54 = vmul.f32 -1.442695, %v2201_v22  ;;  %v3112_v20 = vld [vmem:[%s3350_s3 + $0x60] ss:$12 sps:$4 sm:$0xff]   ;;  %v3126_v21 = vld [vmem:[%s3350_s3 + $0x78] ss:$12 sps:$4 sm:$0xff]  }
 0x423   :  { %2359 = vpow2.f32 %v1824_v15  ;;  %v1825_v56 = vmul.f32 -1.442695, %v2202_v19  ;;  %v3084_v15 = vld [vmem:[%s3350_s3 + $0x30] ss:$12 sps:$4 sm:$0xff]   ;;  %v3098_v19 = vld [vmem:[%s3350_s3 + $0x48] ss:$12 sps:$4 sm:$0xff]  }
 0x424   :  { %v1827_v57 = vmul.f32 -1.442695, %v2203_v4 }
 0x425   :  { %2361 = vpow2.f32 %v1825_v56 }
 0x426   :  { %2363 = vpow2.f32 %v1826_v54 }
 0x427   :  { %2365 = vpow2.f32 %v1827_v57 }
 0x42d   :  { %v2360_v44 = vpop.eup %2359 }
 0x42e   :  { %v1113_v45 = vadd.f32 1.0, %v2360_v44 }
 0x42f   :  { %v2362_v46 = vpop.eup %2361 }
 0x430   :  { %2367 = vrcp.f32 %v1113_v45  ;;  %v1114_v43 = vadd.f32 1.0, %v2362_v46  ;;  %v2364_v63 = vpop.eup %2363 }
 0x431   :  { %v2366_v32 = vpop.eup %2365  ;;  %v1127_v51 = vadd.f32 1.0, %v2364_v63 }
 0x432   :  { %2369 = vrcp.f32 %v1114_v43  ;;  %v1128_v18 = vadd.f32 1.0, %v2366_v32 }
 0x433   :  { %2371 = vrcp.f32 %v1127_v51 }
 0x434   :  { %2373 = vrcp.f32 %v1128_v18 }
 0x43a   :  { %v2368_v55 = vpop.eup %2367 }
 0x43b   :  { %v1135_v53 = vmul.f32 %v2368_v55, %v1133_v2 }
 0x43c   :  { %v2370_v13 = vpop.eup %2369 }
 0x43d   :  { %v1137_v9 = vadd.f32 %v1135_v53, %v2823_v60  ;;  %v1136_v52 = vmul.f32 %v2370_v13, %v1134_v49  ;;  %v2372_v58 = vpop.eup %2371 }
 0x43e   :  { %v2374_v59 = vpop.eup %2373  ;;  %v1141_v50 = vsub.f32 1.0, %v2372_v58  ;;  %v1145_v6 = vmul.f32 %v2372_v58, %v2987_v61  ;;  %v3053_v61 = vld [vmem:[%s3350_s3] ss:$12 sps:$4 sm:$0xff]  }
 0x43f   :  { %2375 = vtanh.f32 %v1137_v9  ;;  %v1138_v47 = vadd.f32 %v1136_v52, %v2829_v0  ;;  %v1142_v3 = vsub.f32 1.0, %v2374_v59  ;;  %v1146_v10 = vmul.f32 %v2374_v59, %v2989_v62  ;;  %v3060_v62 = vld [vmem:[%s3350_s3 + $0x1c] ss:$12 sps:$4 sm:$0xff]  }
 0x441   :  { %2377 = vtanh.f32 %v1138_v47 }
 0x449   :  { %v2376_v29 = vpop.eup %2375 }
 0x44a   :  { %v1143_v5 = vmul.f32 %v2376_v29, %v1141_v50 }
 0x44b   :  { %v2378_v7 = vpop.eup %2377 }
 0x44c   :  { %v1144_v8 = vmul.f32 %v2378_v7, %v1142_v3  ;;  %v3041_v12 = vadd.f32 %v1145_v6, %v1143_v5 }
 0x44e   :  { %v3043_v60 = vadd.f32 %v1146_v10, %v1144_v8 }
 0x450   :  { %v1149_v0 = vpack.c.bf16 %v3043_v60, %v3041_v12 }
 0x452   :  { %1922 = vst [vmem:[%s3354_s6 + $0x18] sm:$0xff] %v1149_v0   ;;  %1200 = vmatmul.mubr.bf16.vlgmr.msra.gmra.mrb[16].mxu0 %v1149_v0  ;;  %2123 = vmatmul.mubr.bf16.vlgmr.msra.gmra.mrb[40].mxu1 %v1149_v0 }
 0x453   :  { %1314 = vmatpush1.bf16.msra.mxu0 %v3053_v61  ;;  %2127 = vmatpush3.bf16.msra.mxu1 %v2647_v24  ;;  %v3077_v24 = vld [vmem:[%s3350_s3 + $0x34] ss:$12 sps:$4 sm:$0xff]  }
 0x454   :  { %1315 = vmatprep.subr.bf16.mxu0 %v3060_v62  ;;  %2128 = vmatprep.subr.bf16.mxu1 %v3368_v35 }
 0x455   :  { %1345 = vmatprep.mubr.bf16.mxu0 %v3369_v36  ;;  %2142 = vmatprep.mubr.msk.bf16.mxu1 %vm2486_vm1, %v3368_v35 }
 0x457   :  { %1316 = vmatpush1.bf16.msra.mxu0 %v3070_v14  ;;  %2129 = vmatpush3.bf16.msra.mxu1 %v2667_v27  ;;  %v3091_v27 = vld [vmem:[%s3350_s3 + $0x4c] ss:$12 sps:$4 sm:$0xff]  }
 0x458   :  { %1317 = vmatprep.subr.bf16.mxu0 %v3077_v24  ;;  %2130 = vmatprep.subr.bf16.mxu1 %v3368_v35 }
 0x45b   :  { %1318 = vmatpush1.bf16.msra.mxu0 %v3084_v15  ;;  %2131 = vmatpush3.bf16.msra.mxu1 %v2686_v30  ;;  %v3105_v30 = vld [vmem:[%s3350_s3 + $0x64] ss:$12 sps:$4 sm:$0xff]  }
 0x45c   :  { %1319 = vmatprep.subr.bf16.mxu0 %v3091_v27  ;;  %2132 = vmatprep.subr.bf16.mxu1 %v3368_v35 }
 0x45f   :  { %1320 = vmatpush1.bf16.msra.mxu0 %v3098_v19  ;;  %2133 = vmatpush3.bf16.msra.mxu1 %v2697_v31  ;;  %v3119_v31 = vld [vmem:[%s3350_s3 + $0x7c] ss:$12 sps:$4 sm:$0xff]  }
 0x460   :  { %1321 = vmatprep.subr.bf16.mxu0 %v3105_v30  ;;  %2134 = vmatprep.subr.bf16.mxu1 %v3368_v35 }
 0x463   :  { %1322 = vmatpush1.bf16.msra.mxu0 %v3112_v20  ;;  %2135 = vmatpush3.bf16.msra.mxu1 %v2709_v33  ;;  %v3133_v33 = vld [vmem:[%s3350_s3 + $0x94] ss:$12 sps:$4 sm:$0xff]  }
 0x464   :  { %1323 = vmatprep.subr.bf16.mxu0 %v3119_v31  ;;  %2136 = vmatprep.subr.bf16.mxu1 %v3368_v35 }
 0x467   :  { %1324 = vmatpush1.bf16.msra.mxu0 %v3126_v21  ;;  %2137 = vmatpush3.bf16.msra.mxu1 %v2718_v34  ;;  %v3146_v34 = vld [vmem:[%s3350_s3 + $0x4] ss:$12 sps:$4 sm:$0xff]  }
 0x468   :  { %1325 = vmatprep.subr.bf16.mxu0 %v3133_v33  ;;  %2138 = vmatprep.subr.bf16.mxu1 %v3368_v35 }
 0x46b   :  { %1326 = vmatpush1.bf16.msra.mxu0 %v2653_v25  ;;  %2139 = vmatpush3.bf16.msra.mxu1 %v2740_v38 }
 0x46c   :  { %1327 = vmatprep.subr.bf16.mxu0 %v2659_v26  ;;  %2140 = vmatprep.subr.bf16.mxu1 %v3368_v35 }
 0x46f   :  { %1328 = vmatpush1.bf16.msra.mxu0 %v2674_v28  ;;  %2141 = vmatpush3.bf16.msra.mxu1 %v2749_v39 }
 0x470   :  { %1459 = vmatprep.subr.bf16.mxu0 %v3146_v34  ;;  %2146 = vmatprep.subr.bf16.mxu1 %v3368_v35 }
 0x525   :  { %v1201_v25 = vpop.f32.mrb[16].mxu0  ;;  %v1244_v22 = vpop.f32.mrb[40].mxu1 }
 0x526   :  { %v2204_v38 = vadd.f32 %v1201_v25, %v2846_v48  ;;  %v1203_v26 = vpop.f32.mrb[17].mxu0  ;;  %v2124_v56 = vpop.f32.mrb[41].mxu1  ;;  %v1279_v9 = vadd.f32 %v2869_v1, %v1244_v22 }
 0x527   :  { %v1205_v4 = vpop.f32.mrb[18].mxu0  ;;  %v1247_v54 = vpop.f32.mrb[42].mxu1  ;;  %v2205_v45 = vadd.f32 %v1203_v26, %v2855_v17 }
 0x528   :  { %v1832_v28 = vmul.f32 -1.442695, %v2204_v38  ;;  %v2206_v39 = vadd.f32 %v1205_v4, %v2846_v48  ;;  %v1207_v57 = vpop.f32.mrb[19].mxu0  ;;  %v2125_v44 = vpop.f32.mrb[43].mxu1  ;;  %v1280_v59 = vadd.f32 %v2869_v1, %v1247_v54  ;;  %v3194_v54 = vld [vmem:[%s3350_s3 + $0x38] ss:$12 sps:$4 sm:$0xff]  }
 0x529   :  { %v2207_v43 = vadd.f32 %v1207_v57, %v2855_v17  ;;  %v1834_v63 = vmul.f32 -1.442695, %v2205_v45  ;;  %v3221_v57 = vld [vmem:[%s3350_s3 + $0x80] ss:$12 sps:$4 sm:$0xff]   ;;  %v3229_v44 = vld [vmem:[%s3350_s3 + $0x90] ss:$12 sps:$4 sm:$0xff]  }
 0x52a   :  { %2379 = vpow2.f32 %v1832_v28  ;;  %v1833_v46 = vmul.f32 -1.442695, %v2206_v39  ;;  %v3203_v28 = vld [vmem:[%s3350_s3 + $0x50] ss:$12 sps:$4 sm:$0xff]   ;;  %v3212_v39 = vld [vmem:[%s3350_s3 + $0x68] ss:$12 sps:$4 sm:$0xff]  }
 0x52b   :  { %v1835_v32 = vmul.f32 -1.442695, %v2207_v43  ;;  %v3235_v45 = vld [vmem:[%s3350_s3 + $0x98] ss:$12 sps:$4 sm:$0xff]   ;;  %v3248_v43 = vld [vmem:[%s3350_s3 + $0xa8] ss:$12 sps:$4 sm:$0xff]  }
 0x52c   :  { %2381 = vpow2.f32 %v1833_v46  ;;  %v3241_v46 = vld [vmem:[%s3350_s3 + $0xac] ss:$12 sps:$4 sm:$0xff]  }
 0x52d   :  { %2383 = vpow2.f32 %v1834_v63  ;;  %v3254_v63 = vld [vmem:[%s3350_s3 + $0xb0] ss:$12 sps:$4 sm:$0xff]  }
 0x52e   :  { %2385 = vpow2.f32 %v1835_v32 }
 0x534   :  { %v2380_v51 = vpop.eup %2379 }
 0x535   :  { %v1259_v2 = vadd.f32 1.0, %v2380_v51 }
 0x536   :  { %v2382_v18 = vpop.eup %2381 }
 0x537   :  { %2387 = vrcp.f32 %v1259_v2  ;;  %v1260_v55 = vadd.f32 1.0, %v2382_v18  ;;  %v2384_v53 = vpop.eup %2383 }
 0x538   :  { %v2386_v49 = vpop.eup %2385  ;;  %v1273_v13 = vadd.f32 1.0, %v2384_v53 }
 0x539   :  { %2389 = vrcp.f32 %v1260_v55  ;;  %v1274_v52 = vadd.f32 1.0, %v2386_v49 }
 0x53a   :  { %2391 = vrcp.f32 %v1273_v13 }
 0x53b   :  { %2393 = vrcp.f32 %v1274_v52 }
 0x541   :  { %v2388_v47 = vpop.eup %2387 }
 0x542   :  { %v1281_v58 = vmul.f32 %v2388_v47, %v1279_v9 }
 0x543   :  { %v2390_v50 = vpop.eup %2389 }
 0x544   :  { %v1283_v29 = vadd.f32 %v1281_v58, %v2838_v16  ;;  %v1282_v3 = vmul.f32 %v2390_v50, %v1280_v59  ;;  %v2392_v6 = vpop.eup %2391 }
 0x545   :  { %v2394_v7 = vpop.eup %2393  ;;  %v1287_v8 = vsub.f32 1.0, %v2392_v6  ;;  %v1291_v22 = vmul.f32 %v2392_v6, %v3041_v12  ;;  %v3173_v12 = vld [vmem:[%s3350_s3 + $0x8] ss:$12 sps:$4 sm:$0xff]  }
 0x546   :  { %2395 = vtanh.f32 %v1283_v29  ;;  %v1284_v5 = vadd.f32 %v1282_v3, %v2844_v37  ;;  %v1288_v0 = vsub.f32 1.0, %v2394_v7  ;;  %v1292_v56 = vmul.f32 %v2394_v7, %v3043_v60  ;;  %v3185_v60 = vld [vmem:[%s3350_s3 + $0x20] ss:$12 sps:$4 sm:$0xff]  }
 0x548   :  { %2397 = vtanh.f32 %v1284_v5 }
 0x550   :  { %v2396_v10 = vpop.eup %2395 }
 0x551   :  { %v1289_v25 = vmul.f32 %v2396_v10, %v1287_v8 }
 0x552   :  { %v2398_v38 = vpop.eup %2397 }
 0x553   :  { %v1290_v26 = vmul.f32 %v2398_v38, %v1288_v0  ;;  %v3160_v4 = vadd.f32 %v1291_v22, %v1289_v25 }
 0x555   :  { %v3162_v16 = vadd.f32 %v1292_v56, %v1290_v26 }
 0x557   :  { %v1295_v37 = vpack.c.bf16 %v3162_v16, %v3160_v4 }
 0x559   :  { %1923 = vst [vmem:[%s3354_s6 + $0x20] sm:$0xff] %v1295_v37   ;;  %1346 = vmatmul.mubr.bf16.vlgmr.msra.gmra.mrb[20].mxu0 %v1295_v37  ;;  %2143 = vmatmul.mubr.bf16.vlgmr.msra.gmra.mrb[44].mxu1 %v1295_v37 }
 0x55a   :  { %1460 = vmatpush1.bf16.msra.mxu0 %v3053_v61  ;;  %2147 = vmatpush3.bf16.msra.mxu1 %v3173_v12 }
 0x55b   :  { %1461 = vmatprep.subr.bf16.mxu0 %v3060_v62  ;;  %2148 = vmatprep.subr.bf16.mxu1 %v3368_v35 }
 0x55c   :  { %1491 = vmatprep.mubr.bf16.mxu0 %v3369_v36  ;;  %2162 = vmatprep.mubr.msk.bf16.mxu1 %vm2486_vm1, %v3368_v35 }
 0x55e   :  { %1462 = vmatpush1.bf16.msra.mxu0 %v3070_v14  ;;  %2149 = vmatpush3.bf16.msra.mxu1 %v3185_v60 }
 0x55f   :  { %1463 = vmatprep.subr.bf16.mxu0 %v3077_v24  ;;  %2150 = vmatprep.subr.bf16.mxu1 %v3368_v35 }
 0x562   :  { %1464 = vmatpush1.bf16.msra.mxu0 %v3084_v15  ;;  %2151 = vmatpush3.bf16.msra.mxu1 %v3194_v54 }
 0x563   :  { %1465 = vmatprep.subr.bf16.mxu0 %v3091_v27  ;;  %2152 = vmatprep.subr.bf16.mxu1 %v3368_v35 }
 0x566   :  { %1466 = vmatpush1.bf16.msra.mxu0 %v3098_v19  ;;  %2153 = vmatpush3.bf16.msra.mxu1 %v3203_v28 }
 0x567   :  { %1467 = vmatprep.subr.bf16.mxu0 %v3105_v30  ;;  %2154 = vmatprep.subr.bf16.mxu1 %v3368_v35 }
 0x56a   :  { %1468 = vmatpush1.bf16.msra.mxu0 %v3112_v20  ;;  %2155 = vmatpush3.bf16.msra.mxu1 %v3212_v39 }
 0x56b   :  { %1469 = vmatprep.subr.bf16.mxu0 %v3119_v31  ;;  %2156 = vmatprep.subr.bf16.mxu1 %v3368_v35 }
 0x56e   :  { %1470 = vmatpush1.bf16.msra.mxu0 %v3126_v21  ;;  %2157 = vmatpush3.bf16.msra.mxu1 %v3221_v57 }
 0x56f   :  { %1471 = vmatprep.subr.bf16.mxu0 %v3133_v33  ;;  %2158 = vmatprep.subr.bf16.mxu1 %v3368_v35 }
 0x572   :  { %1472 = vmatpush1.bf16.msra.mxu0 %v3229_v44  ;;  %2159 = vmatpush3.bf16.msra.mxu1 %v3235_v45 }
 0x573   :  { %1473 = vmatprep.subr.bf16.mxu0 %v3241_v46  ;;  %2160 = vmatprep.subr.bf16.mxu1 %v3368_v35 }
 0x576   :  { %1474 = vmatpush1.bf16.msra.mxu0 %v3248_v43  ;;  %2161 = vmatpush3.bf16.msra.mxu1 %v3254_v63 }
 0x577   :  { %1605 = vmatprep.subr.bf16.mxu0 %v3146_v34  ;;  %2166 = vmatprep.subr.bf16.mxu1 %v3368_v35 }
 0x62c   :  { %v1347_v32 = vpop.f32.mrb[20].mxu0  ;;  %v1390_v51 = vpop.f32.mrb[44].mxu1 }
 0x62d   :  { %v2208_v2 = vadd.f32 %v1347_v32, %v2846_v48  ;;  %v1349_v18 = vpop.f32.mrb[21].mxu0  ;;  %v2144_v55 = vpop.f32.mrb[45].mxu1  ;;  %v1425_v25 = vadd.f32 %v2869_v1, %v1390_v51 }
 0x62e   :  { %v1351_v53 = vpop.f32.mrb[22].mxu0  ;;  %v1393_v49 = vpop.f32.mrb[46].mxu1  ;;  %v2209_v58 = vadd.f32 %v1349_v18, %v2855_v17 }
 0x62f   :  { %v1840_v13 = vmul.f32 -1.442695, %v2208_v2  ;;  %v2210_v9 = vadd.f32 %v1351_v53, %v2846_v48  ;;  %v1353_v52 = vpop.f32.mrb[23].mxu0  ;;  %v2145_v47 = vpop.f32.mrb[47].mxu1  ;;  %v1426_v56 = vadd.f32 %v2869_v1, %v1393_v49 }
 0x630   :  { %v2211_v34 = vadd.f32 %v1353_v52, %v2855_v17  ;;  %v1842_v50 = vmul.f32 -1.442695, %v2209_v58 }
 0x631   :  { %2399 = vpow2.f32 %v1840_v13  ;;  %v1841_v59 = vmul.f32 -1.442695, %v2210_v9 }
 0x632   :  { %v1843_v29 = vmul.f32 -1.442695, %v2211_v34 }
 0x633   :  { %2401 = vpow2.f32 %v1841_v59 }
 0x634   :  { %2403 = vpow2.f32 %v1842_v50 }
 0x635   :  { %2405 = vpow2.f32 %v1843_v29 }
 0x63b   :  { %v2400_v3 = vpop.eup %2399 }
 0x63c   :  { %v1405_v5 = vadd.f32 1.0, %v2400_v3 }
 0x63d   :  { %v2402_v6 = vpop.eup %2401 }
 0x63e   :  { %2407 = vrcp.f32 %v1405_v5  ;;  %v1406_v7 = vadd.f32 1.0, %v2402_v6  ;;  %v2404_v8 = vpop.eup %2403  ;;  %v3371_v6 = vld [vmem:[#allocation10_spill] sm:$0xff] }
 0x63f   :  { %v2406_v10 = vpop.eup %2405  ;;  %v1419_v0 = vadd.f32 1.0, %v2404_v8 }
 0x640   :  { %2409 = vrcp.f32 %v1406_v7  ;;  %v1420_v22 = vadd.f32 1.0, %v2406_v10  ;;  %v3372_v10 = vld [vmem:[#allocation12_spill] sm:$0xff] }
 0x641   :  { %2411 = vrcp.f32 %v1419_v0 }
 0x642   :  { %2413 = vrcp.f32 %v1420_v22 }
 0x648   :  { %v2408_v38 = vpop.eup %2407 }
 0x649   :  { %v1427_v26 = vmul.f32 %v2408_v38, %v1425_v25 }
 0x64a   :  { %v2410_v37 = vpop.eup %2409 }
 0x64b   :  { %v1429_v32 = vadd.f32 %v1427_v26, %v2835_v11  ;;  %v1428_v2 = vmul.f32 %v2410_v37, %v1426_v56  ;;  %v2412_v55 = vpop.eup %2411 }
 0x64c   :  { %v2414_v53 = vpop.eup %2413  ;;  %v1433_v13 = vsub.f32 1.0, %v2412_v55  ;;  %v1437_v47 = vmul.f32 %v2412_v55, %v3160_v4 }
 0x64d   :  { %2415 = vtanh.f32 %v1429_v32  ;;  %v1430_v18 = vadd.f32 %v1428_v2, %v2841_v23  ;;  %v1434_v51 = vsub.f32 1.0, %v2414_v53  ;;  %v1438_v1 = vmul.f32 %v2414_v53, %v3162_v16 }
 0x64f   :  { %2417 = vtanh.f32 %v1430_v18 }
 0x657   :  { %v2416_v9 = vpop.eup %2415 }
 0x658   :  { %v1435_v52 = vmul.f32 %v2416_v9, %v1433_v13 }
 0x659   :  { %v2418_v58 = vpop.eup %2417 }
 0x65a   :  { %v1436_v59 = vmul.f32 %v2418_v58, %v1434_v51  ;;  %v3269_v49 = vadd.f32 %v1437_v47, %v1435_v52  ;;  %v3373_v51 = vld [vmem:[#allocation5_spill] sm:$0xff]  ;;  %v3374_v47 = vld [vmem:[#allocation6_spill] sm:$0xff] }
 0x65b   :  { %v255_v52 = vadd.f32 %v3373_v51, %v2846_v48  ;;  %v257_v58 = vadd.f32 %v3374_v47, %v2855_v17 }
 0x65c   :  { %v3271_v11 = vadd.f32 %v1438_v1, %v1436_v59 }
 0x65e   :  { %v1441_v23 = vpack.c.bf16 %v3271_v11, %v3269_v49 }
 0x660   :  { %1924 = vst [vmem:[%s3354_s6 + $0x28] sm:$0xff] %v1441_v23   ;;  %1492 = vmatmul.mubr.bf16.vlgmr.msra.gmra.mrb[24].mxu0 %v1441_v23  ;;  %2163 = vmatmul.mubr.bf16.vlgmr.msra.gmra.mrb[48].mxu1 %v1441_v23 }
 0x661   :  { %1606 = vmatpush1.bf16.msra.mxu0 %v3053_v61  ;;  %2167 = vmatpush3.bf16.msra.mxu1 %v3173_v12  ;;  %v247_v61 = vadd.f32 %v2793_v41, %v2855_v17 }
 0x662   :  { %1607 = vmatprep.subr.bf16.mxu0 %v3060_v62  ;;  %2168 = vmatprep.subr.bf16.mxu1 %v3368_v35 }
 0x663   :  { %1637 = vmatprep.mubr.bf16.mxu0 %v3369_v36  ;;  %2182 = vmatprep.mubr.msk.bf16.mxu1 %vm2486_vm1, %v3368_v35  ;;  %v245_v36 = vadd.f32 %v2791_v40, %v2846_v48 }
 0x665   :  { %1608 = vmatpush1.bf16.msra.mxu0 %v3070_v14  ;;  %2169 = vmatpush3.bf16.msra.mxu1 %v3185_v60 }
 0x666   :  { %1609 = vmatprep.subr.bf16.mxu0 %v3077_v24  ;;  %2170 = vmatprep.subr.bf16.mxu1 %v3368_v35  ;;  %v249_v24 = vadd.f32 %v2795_v42, %v2846_v48 }
 0x669   :  { %1610 = vmatpush1.bf16.msra.mxu0 %v3084_v15  ;;  %2171 = vmatpush3.bf16.msra.mxu1 %v3194_v54 }
 0x66a   :  { %1611 = vmatprep.subr.bf16.mxu0 %v3091_v27  ;;  %2172 = vmatprep.subr.bf16.mxu1 %v3368_v35 }
 0x66d   :  { %1612 = vmatpush1.bf16.msra.mxu0 %v3098_v19  ;;  %2173 = vmatpush3.bf16.msra.mxu1 %v3203_v28 }
 0x66e   :  { %1613 = vmatprep.subr.bf16.mxu0 %v3105_v30  ;;  %2174 = vmatprep.subr.bf16.mxu1 %v3368_v35 }
 0x671   :  { %1614 = vmatpush1.bf16.msra.mxu0 %v3112_v20  ;;  %2175 = vmatpush3.bf16.msra.mxu1 %v3212_v39 }
 0x672   :  { %1615 = vmatprep.subr.bf16.mxu0 %v3119_v31  ;;  %2176 = vmatprep.subr.bf16.mxu1 %v3368_v35 }
 0x675   :  { %1616 = vmatpush1.bf16.msra.mxu0 %v3126_v21  ;;  %2177 = vmatpush3.bf16.msra.mxu1 %v3221_v57 }
 0x676   :  { %1617 = vmatprep.subr.bf16.mxu0 %v3133_v33  ;;  %2178 = vmatprep.subr.bf16.mxu1 %v3368_v35 }
 0x679   :  { %1618 = vmatpush1.bf16.msra.mxu0 %v3229_v44  ;;  %2179 = vmatpush3.bf16.msra.mxu1 %v3235_v45 }
 0x67a   :  { %1619 = vmatprep.subr.bf16.mxu0 %v3241_v46  ;;  %2180 = vmatprep.subr.bf16.mxu1 %v3368_v35  ;;  %v3370_v35 = vld [vmem:[#allocation4_spill] sm:$0xff] }
 0x67b   :  { %v251_v30 = vadd.f32 %v3370_v35, %v2855_v17 }
 0x67d   :  { %1620 = vmatpush1.bf16.msra.mxu0 %v3248_v43  ;;  %2181 = vmatpush3.bf16.msra.mxu1 %v3254_v63  ;;  %v3322_v43 = vld [vmem:[%s3353_s4] ss:$0 sm:$0xff] }
 0x733   :  { %v1493_v62 = vpop.f32.mrb[24].mxu0  ;;  %v1536_v14 = vpop.f32.mrb[48].mxu1 }
 0x734   :  { %v1543_v15 = vadd.f32 %v1493_v62, %v245_v36  ;;  %v1495_v27 = vpop.f32.mrb[25].mxu0  ;;  %v2164_v19 = vpop.f32.mrb[49].mxu1  ;;  %v1571_v63 = vadd.f32 %v3322_v43, %v1536_v14  ;;  %v3376_v62 = vld [vmem:[#allocation8_spill] sm:$0xff] }
 0x735   :  { %v1557_v20 = vadd.f32 %v1495_v27, %v247_v61  ;;  %v1497_v31 = vpop.f32.mrb[26].mxu0  ;;  %v1539_v21 = vpop.f32.mrb[50].mxu1  ;;  %v261_v14 = vadd.f32 %v3376_v62, %v2855_v17 }
 0x736   :  { %v1848_v33 = vmul.f32 -1.442695, %v1543_v15  ;;  %v1544_v4 = vadd.f32 %v1497_v31, %v249_v24  ;;  %v1499_v40 = vpop.f32.mrb[27].mxu0  ;;  %v2165_v16 = vpop.f32.mrb[51].mxu1  ;;  %v1572_v3 = vadd.f32 %v3322_v43, %v1539_v21 }
 0x737   :  { %v1558_v12 = vadd.f32 %v1499_v40, %v251_v30  ;;  %v1850_v60 = vmul.f32 -1.442695, %v1557_v20 }
 0x738   :  { %2419 = vpow2.f32 %v1848_v33  ;;  %v1849_v41 = vmul.f32 -1.442695, %v1544_v4 }
 0x739   :  { %v1851_v54 = vmul.f32 -1.442695, %v1558_v12 }
 0x73a   :  { %2421 = vpow2.f32 %v1849_v41 }
 0x73b   :  { %2423 = vpow2.f32 %v1850_v60 }
 0x73c   :  { %2425 = vpow2.f32 %v1851_v54 }
 0x742   :  { %v2420_v42 = vpop.eup %2419 }
 0x743   :  { %v1551_v28 = vadd.f32 1.0, %v2420_v42 }
 0x744   :  { %v2422_v39 = vpop.eup %2421 }
 0x745   :  { %2427 = vrcp.f32 %v1551_v28  ;;  %v1552_v57 = vadd.f32 1.0, %v2422_v39  ;;  %v2424_v44 = vpop.eup %2423 }
 0x746   :  { %v2426_v45 = vpop.eup %2425  ;;  %v1565_v46 = vadd.f32 1.0, %v2424_v44 }
 0x747   :  { %2429 = vrcp.f32 %v1552_v57  ;;  %v1566_v34 = vadd.f32 1.0, %v2426_v45  ;;  %v3377_v45 = vld [vmem:[#allocation9_spill] sm:$0xff] }
 0x748   :  { %2431 = vrcp.f32 %v1565_v46 }
 0x749   :  { %2433 = vrcp.f32 %v1566_v34  ;;  %v3378_v34 = vld [vmem:[#allocation11_spill] sm:$0xff] }
 0x74f   :  { %v2428_v50 = vpop.eup %2427 }
 0x750   :  { %v1573_v29 = vmul.f32 %v2428_v50, %v1571_v63 }
 0x751   :  { %v2430_v5 = vpop.eup %2429 }
 0x752   :  { %v1575_v7 = vadd.f32 %v1573_v29, %v3371_v6  ;;  %v1574_v8 = vmul.f32 %v2430_v5, %v1572_v3  ;;  %v2432_v25 = vpop.eup %2431 }
 0x753   :  { %v2434_v22 = vpop.eup %2433  ;;  %v1579_v38 = vsub.f32 1.0, %v2432_v25  ;;  %v1583_v32 = vmul.f32 %v2432_v25, %v3269_v49  ;;  %v3375_v49 = vld [vmem:[#allocation7_spill] sm:$0xff] }
 0x754   :  { %2435 = vtanh.f32 %v1575_v7  ;;  %v1576_v0 = vadd.f32 %v1574_v8, %v3372_v10  ;;  %v1580_v56 = vsub.f32 1.0, %v2434_v22  ;;  %v1584_v55 = vmul.f32 %v2434_v22, %v3271_v11 }
 0x755   :  { %v259_v11 = vadd.f32 %v3375_v49, %v2846_v48 }
 0x756   :  { %2437 = vtanh.f32 %v1576_v0 }
 0x75e   :  { %v2436_v26 = vpop.eup %2435 }
 0x75f   :  { %v1581_v37 = vmul.f32 %v2436_v26, %v1579_v38 }
 0x760   :  { %v2438_v2 = vpop.eup %2437 }
 0x761   :  { %v1582_v18 = vmul.f32 %v2438_v2, %v1580_v56  ;;  %v1585_v53 = vadd.f32 %v1583_v32, %v1581_v37 }
 0x763   :  { %v1586_v13 = vadd.f32 %v1584_v55, %v1582_v18 }
 0x765   :  { %v1587_v9 = vpack.c.bf16 %v1586_v13, %v1585_v53 }
 0x767   :  { %1925 = vst [vmem:[%s3354_s6 + $0x30] sm:$0xff] %v1587_v9   ;;  %1638 = vmatmul.mubr.bf16.vlgmr.msra.gmra.mrb[28].mxu0 %v1587_v9  ;;  %2183 = vmatmul.mubr.bf16.vlgmr.msra.gmra.mrb[52].mxu1 %v1587_v9 }
 0x83a   :  { %v1639_v59 = vpop.f32.mrb[28].mxu0  ;;  %v1682_v1 = vpop.f32.mrb[52].mxu1 }
 0x83b   :  { %v1689_v23 = vadd.f32 %v1639_v59, %v255_v52  ;;  %v1641_v36 = vpop.f32.mrb[29].mxu0  ;;  %v2184_v61 = vpop.f32.mrb[53].mxu1  ;;  %v1717_v54 = vadd.f32 %v3322_v43, %v1682_v1 }
 0x83c   :  { %v1703_v24 = vadd.f32 %v1641_v36, %v257_v58  ;;  %v1643_v15 = vpop.f32.mrb[30].mxu0  ;;  %v1685_v27 = vpop.f32.mrb[54].mxu1 }
 0x83d   :  { %v1856_v19 = vmul.f32 -1.442695, %v1689_v23  ;;  %v1690_v35 = vadd.f32 %v1643_v15, %v259_v11  ;;  %v1645_v30 = vpop.f32.mrb[31].mxu0  ;;  %v2185_v20 = vpop.f32.mrb[55].mxu1  ;;  %v1718_v57 = vadd.f32 %v3322_v43, %v1685_v27 }
 0x83e   :  { %v1704_v31 = vadd.f32 %v1645_v30, %v261_v14  ;;  %v1858_v33 = vmul.f32 -1.442695, %v1703_v24 }
 0x83f   :  { %2439 = vpow2.f32 %v1856_v19  ;;  %v1857_v21 = vmul.f32 -1.442695, %v1690_v35 }
 0x840   :  { %v1859_v4 = vmul.f32 -1.442695, %v1704_v31 }
 0x841   :  { %2441 = vpow2.f32 %v1857_v21 }
 0x842   :  { %2443 = vpow2.f32 %v1858_v33 }
 0x843   :  { %2445 = vpow2.f32 %v1859_v4 }
 0x849   :  { %v2440_v48 = vpop.eup %2439 }
 0x84a   :  { %v1697_v40 = vadd.f32 1.0, %v2440_v48 }
 0x84b   :  { %v2442_v16 = vpop.eup %2441 }
 0x84c   :  { %2447 = vrcp.f32 %v1697_v40  ;;  %v1698_v17 = vadd.f32 1.0, %v2442_v16  ;;  %v2444_v12 = vpop.eup %2443 }
 0x84d   :  { %v2446_v41 = vpop.eup %2445  ;;  %v1711_v60 = vadd.f32 1.0, %v2444_v12 }
 0x84e   :  { %2449 = vrcp.f32 %v1698_v17  ;;  %v1712_v42 = vadd.f32 1.0, %v2446_v41 }
 0x84f   :  { %2451 = vrcp.f32 %v1711_v60 }
 0x850   :  { %2453 = vrcp.f32 %v1712_v42 }
 0x856   :  { %v2448_v28 = vpop.eup %2447 }
 0x857   :  { %v1719_v39 = vmul.f32 %v2448_v28, %v1717_v54 }
 0x858   :  { %v2450_v44 = vpop.eup %2449 }
 0x859   :  { %v1721_v46 = vadd.f32 %v1719_v39, %v3377_v45  ;;  %v1720_v63 = vmul.f32 %v2450_v44, %v1718_v57  ;;  %v2452_v29 = vpop.eup %2451 }
 0x85a   :  { %v2454_v3 = vpop.eup %2453  ;;  %v1725_v5 = vsub.f32 1.0, %v2452_v29  ;;  %v1729_v8 = vmul.f32 %v2452_v29, %v1585_v53 }
 0x85b   :  { %2455 = vtanh.f32 %v1721_v46  ;;  %v1722_v50 = vadd.f32 %v1720_v63, %v3378_v34  ;;  %v1726_v10 = vsub.f32 1.0, %v2454_v3  ;;  %v1730_v43 = vmul.f32 %v2454_v3, %v1586_v13 }
 0x85d   :  { %2457 = vtanh.f32 %v1722_v50 }
 0x865   :  { %v2456_v6 = vpop.eup %2455 }
 0x866   :  { %v1727_v7 = vmul.f32 %v2456_v6, %v1725_v5 }
 0x867   :  { %v2458_v0 = vpop.eup %2457 }
 0x868   :  { %v1731_v25 = vadd.f32 %v1729_v8, %v1727_v7  ;;  %v1728_v22 = vmul.f32 %v2458_v0, %v1726_v10 }
 0x86a   :  { %v1732_v38 = vadd.f32 %v1730_v43, %v1728_v22 }
 0x86c   :  { %v1918_v26 = vpack.c.bf16 %v1732_v38, %v1731_v25 }
 0x86e   :  { %1926 = vst [vmem:[%s3354_s6 + $0x38] sm:$0xff] %v1918_v26  }

</bundles_post_ra>
